<compile_context>
chip_gen: v7x
topology: tpu7x:2x2x1
jax: 0.10.0
libtpu: 0.0.40
codegen_flags: <defaults>
</compile_context>

<pallas_src>
import math

import jax
import jax.numpy as jnp
from jax.experimental import pallas as pl
from jax.experimental.pallas import tpu as pltpu

# ----- model hyper-params (small, kernel-friendly scale-down of the module) -----
D_MODEL = 128
NUM_HEADS = 4
D_K = D_MODEL // NUM_HEADS
D_FF = 256
BATCH = 2
SEQ = 8
LN_EPS = 1e-5


def encoder_layer_kernel(
    x_ref, mask_ref,
    wqkv_ref, bqkv_ref, wo_ref, bo_ref,
    g1_ref, b1_ref,
    w1_ref, bf1_ref, w2_ref, bf2_ref,
    g2_ref, b2_ref,
    out_ref,
):
    x = x_ref[...]                # (B*S, D)    all tokens of all batches
    mask_add = mask_ref[...]      # (H*B, S, S) additive mask: 0 keep / -1e9 masked

    # ---- fused QKV projection: one (B*S, D) @ (D, 3D) MXU matmul ----
    qkv = jnp.dot(x, wqkv_ref[...], preferred_element_type=jnp.float32) + bqkv_ref[...]

    # static lane slices at multiples of 128 lanes, then free leading-dim splits
    q = qkv[:, :D_MODEL].reshape(BATCH, SEQ, D_MODEL)
    k = qkv[:, D_MODEL:2 * D_MODEL].reshape(BATCH, SEQ, D_MODEL)
    v = qkv[:, 2 * D_MODEL:].reshape(BATCH, SEQ, D_MODEL)

    # ---- head-batched attention ----
    # Build (H*B, S, d_k) once (leading-axis stacking of static lane slices);
    # index ordering is h*B + b, matching the tiled mask from the wrapper.
    def split_heads(t):  # (B, S, D) -> (H*B, S, d_k)
        return jnp.concatenate(
            [t[:, :, h * D_K:(h + 1) * D_K] for h in range(NUM_HEADS)], axis=0)

    qh = split_heads(q)
    kh = split_heads(k)
    vh = split_heads(v)

    scale = 1.0 / math.sqrt(D_K)
    scores = jnp.einsum("bqd,bkd->bqk", qh, kh,
                        preferred_element_type=jnp.float32) * scale + mask_add

    # explicit softmax: reciprocal goes to the EUP slot (free vs VALU)
    m = jnp.max(scores, axis=-1, keepdims=True)
    e = jnp.exp(scores - m)
    denom = jnp.sum(e, axis=-1, keepdims=True)
    probs = e * pl.reciprocal(denom, approx=True)

    ctx = jnp.einsum("bqk,bkd->bqd", probs, vh,
                     preferred_element_type=jnp.float32)       # (H*B, S, d_k)

    # merge heads back to (B*S, D): one lane concat, done once
    attn = jnp.concatenate(
        [ctx[h * BATCH:(h + 1) * BATCH] for h in range(NUM_HEADS)], axis=-1)
    attn = attn.reshape(BATCH * SEQ, D_MODEL)

    attn_out = jnp.dot(attn, wo_ref[...],
                       preferred_element_type=jnp.float32) + bo_ref[...]

    # ---- residual + LayerNorm 1 ----
    r1 = x + attn_out
    mu1 = jnp.mean(r1, axis=-1, keepdims=True)
    var1 = jnp.mean((r1 - mu1) ** 2, axis=-1, keepdims=True)
    n1 = (r1 - mu1) * jax.lax.rsqrt(var1 + LN_EPS) * g1_ref[...] + b1_ref[...]

    # ---- position-wise feed-forward ----
    h1 = jnp.maximum(
        jnp.dot(n1, w1_ref[...], preferred_element_type=jnp.float32) + bf1_ref[...],
        0.0)
    ff = jnp.dot(h1, w2_ref[...], preferred_element_type=jnp.float32) + bf2_ref[...]

    # ---- residual + LayerNorm 2 ----
    r2 = n1 + ff
    mu2 = jnp.mean(r2, axis=-1, keepdims=True)
    var2 = jnp.mean((r2 - mu2) ** 2, axis=-1, keepdims=True)
    out_ref[...] = (r2 - mu2) * jax.lax.rsqrt(var2 + LN_EPS) * g2_ref[...] + b2_ref[...]


def encoder_layer(x, mask, params):
    (wq, bq, wk, bk, wv, bv, wo, bo,
     g1, beta1, w1, bf1, w2, bf2, g2, beta2) = params
    B, S, D = x.shape

    # wrapper-side packing (done once, outside the hot kernel)
    wqkv = jnp.concatenate([wq, wk, wv], axis=1)        # (D, 3D)
    bqkv = jnp.concatenate([bq, bk, bv], axis=1)        # (1, 3D)
    mask_add = (mask - 1.0) * 1e9                       # (B, S, S): 0 keep / -1e9 masked
    mask_add = jnp.tile(mask_add, (NUM_HEADS, 1, 1))    # (H*B, S, S), index = h*B + b
    x_flat = x.reshape(B * S, D)

    # whole-array VMEM blocks, empty grid (total resident data << VMEM)
    vmem = pl.BlockSpec(memory_space=pltpu.MemorySpace.VMEM)
    out_flat = pl.pallas_call(
        encoder_layer_kernel,
        out_shape=jax.ShapeDtypeStruct((B * S, D), jnp.float32),
        in_specs=[vmem] * 14,
        out_specs=vmem,
    )(x_flat, mask_add, wqkv, bqkv, wo, bo,
      g1, beta1, w1, bf1, w2, bf2, g2, beta2)
    return out_flat.reshape(B, S, D)


def make_params(key):
    ks = jax.random.split(key, 12)
    s = 0.02
    wq = jax.random.normal(ks[0], (D_MODEL, D_MODEL), jnp.float32) * s
    wk = jax.random.normal(ks[1], (D_MODEL, D_MODEL), jnp.float32) * s
    wv = jax.random.normal(ks[2], (D_MODEL, D_MODEL), jnp.float32) * s
    wo = jax.random.normal(ks[3], (D_MODEL, D_MODEL), jnp.float32) * s
    bq = jax.random.normal(ks[4], (1, D_MODEL), jnp.float32) * s
    bk = jax.random.normal(ks[5], (1, D_MODEL), jnp.float32) * s
    bv = jax.random.normal(ks[6], (1, D_MODEL), jnp.float32) * s
    bo = jax.random.normal(ks[7], (1, D_MODEL), jnp.float32) * s
    w1 = jax.random.normal(ks[8], (D_MODEL, D_FF), jnp.float32) * s
    bf1 = jax.random.normal(ks[9], (1, D_FF), jnp.float32) * s
    w2 = jax.random.normal(ks[10], (D_FF, D_MODEL), jnp.float32) * s
    bf2 = jax.random.normal(ks[11], (1, D_MODEL), jnp.float32) * s
    g1 = jnp.ones((1, D_MODEL), jnp.float32)
    beta1 = jnp.zeros((1, D_MODEL), jnp.float32)
    g2 = jnp.ones((1, D_MODEL), jnp.float32)
    beta2 = jnp.zeros((1, D_MODEL), jnp.float32)
    return (wq, bq, wk, bk, wv, bv, wo, bo, g1, beta1, w1, bf1, w2, bf2, g2, beta2)


def reference(x, mask, params):
    (wq, bq, wk, bk, wv, bv, wo, bo,
     g1, beta1, w1, bf1, w2, bf2, g2, beta2) = params
    B, S, D = x.shape
    q = x @ wq + bq
    k = x @ wk + bk
    v = x @ wv + bv

    def split(t):  # (B,S,D) -> (B,H,S,dk)
        return t.reshape(B, S, NUM_HEADS, D_K).transpose(0, 2, 1, 3)

    qh, kh, vh = split(q), split(k), split(v)
    scores = jnp.einsum("bhqd,bhkd->bhqk", qh, kh) / math.sqrt(D_K)
    scores = jnp.where(mask[:, None, :, :] == 0, -1e9, scores)
    probs = jax.nn.softmax(scores, axis=-1)
    attn = jnp.einsum("bhqk,bhkd->bhqd", probs, vh)
    attn = attn.transpose(0, 2, 1, 3).reshape(B, S, D)
    attn_out = attn @ wo + bo

    def ln(t, g, b):
        mu = jnp.mean(t, -1, keepdims=True)
        var = jnp.mean((t - mu) ** 2, -1, keepdims=True)
        return (t - mu) * jax.lax.rsqrt(var + LN_EPS) * g + b

    n1 = ln(x + attn_out, g1, beta1)
    ff = jnp.maximum(n1 @ w1 + bf1, 0.0) @ w2 + bf2
    return ln(n1 + ff, g2, beta2)


if __name__ == "__main__":
    key = jax.random.PRNGKey(0)
    kx, kp = jax.random.split(key)
    x = jax.random.normal(kx, (BATCH, SEQ, D_MODEL), jnp.float32)
    # padding-style mask: last two key positions masked out
    mask = jnp.ones((BATCH, SEQ, SEQ), jnp.float32)
    mask = mask.at[:, :, -2:].set(0.0)
    params = make_params(kp)

    out = encoder_layer(x, mask, params)
    out = jax.block_until_ready(out)

    ref = reference(x, mask, params)
    assert out.shape == (BATCH, SEQ, D_MODEL)
    assert jnp.allclose(out, ref, atol=2e-3, rtol=2e-3), "mismatch vs reference"
    print("KERNEL_OK")
</pallas_src>

<mosaic_0001>
module attributes {stable_mosaic.version = 11 : i64} {
  func.func @encoder_layer_kernel(%arg0: memref<16x128xf32, #tpu.memory_space<vmem>>, %arg1: memref<8x8x8xf32, #tpu.memory_space<vmem>>, %arg2: memref<128x384xf32, #tpu.memory_space<vmem>>, %arg3: memref<1x384xf32, #tpu.memory_space<vmem>>, %arg4: memref<128x128xf32, #tpu.memory_space<vmem>>, %arg5: memref<1x128xf32, #tpu.memory_space<vmem>>, %arg6: memref<1x128xf32, #tpu.memory_space<vmem>>, %arg7: memref<1x128xf32, #tpu.memory_space<vmem>>, %arg8: memref<128x256xf32, #tpu.memory_space<vmem>>, %arg9: memref<1x256xf32, #tpu.memory_space<vmem>>, %arg10: memref<256x128xf32, #tpu.memory_space<vmem>>, %arg11: memref<1x128xf32, #tpu.memory_space<vmem>>, %arg12: memref<1x128xf32, #tpu.memory_space<vmem>>, %arg13: memref<1x128xf32, #tpu.memory_space<vmem>>, %arg14: memref<16x128xf32, #tpu.memory_space<vmem>>) attributes {dimension_semantics = [], scalar_prefetch = 0 : i64, scratch_operands = 0 : i64, tpu.core_type = #tpu.core_type<tc>} {
    %c0 = arith.constant 0 : index
    %c0_0 = arith.constant 0 : index
    %0 = vector.load %arg0[%c0, %c0_0] : memref<16x128xf32, #tpu.memory_space<vmem>>, vector<16x128xf32>
    %c0_1 = arith.constant 0 : index
    %c0_2 = arith.constant 0 : index
    %c0_3 = arith.constant 0 : index
    %1 = vector.load %arg1[%c0_1, %c0_2, %c0_3] : memref<8x8x8xf32, #tpu.memory_space<vmem>>, vector<8x8x8xf32>
    %c0_4 = arith.constant 0 : index
    %c0_5 = arith.constant 0 : index
    %2 = vector.load %arg2[%c0_4, %c0_5] : memref<128x384xf32, #tpu.memory_space<vmem>>, vector<128x384xf32>
    %cst = arith.constant dense<0.000000e+00> : vector<16x384xf32>
    %3 = tpu.matmul %0, %2, %cst {dimension_numbers = #tpu.dot_dimension_numbers<[1], [0], [0], [1], [0, 0, 1, 1], [], []>} : vector<16x128xf32>, vector<128x384xf32>, vector<16x384xf32> -> vector<16x384xf32>
    %c0_6 = arith.constant 0 : index
    %c0_7 = arith.constant 0 : index
    %4 = vector.load %arg3[%c0_6, %c0_7] : memref<1x384xf32, #tpu.memory_space<vmem>>, vector<1x384xf32>
    %5 = vector.broadcast %4 : vector<1x384xf32> to vector<16x384xf32>
    %6 = arith.addf %3, %5 : vector<16x384xf32>
    %7 = vector.extract_strided_slice %6 {offsets = [0, 0], sizes = [16, 128], strides = [1, 1]} : vector<16x384xf32> to vector<16x128xf32>
    %8 = vector.shape_cast %7 : vector<16x128xf32> to vector<2x8x128xf32>
    %9 = vector.extract_strided_slice %6 {offsets = [0, 128], sizes = [16, 128], strides = [1, 1]} : vector<16x384xf32> to vector<16x128xf32>
    %10 = vector.shape_cast %9 : vector<16x128xf32> to vector<2x8x128xf32>
    %11 = vector.extract_strided_slice %6 {offsets = [0, 256], sizes = [16, 128], strides = [1, 1]} : vector<16x384xf32> to vector<16x128xf32>
    %12 = vector.shape_cast %11 : vector<16x128xf32> to vector<2x8x128xf32>
    %13 = vector.extract_strided_slice %8 {offsets = [0, 0, 0], sizes = [2, 8, 32], strides = [1, 1, 1]} : vector<2x8x128xf32> to vector<2x8x32xf32>
    %14 = vector.extract_strided_slice %8 {offsets = [0, 0, 32], sizes = [2, 8, 32], strides = [1, 1, 1]} : vector<2x8x128xf32> to vector<2x8x32xf32>
    %15 = vector.extract_strided_slice %8 {offsets = [0, 0, 64], sizes = [2, 8, 32], strides = [1, 1, 1]} : vector<2x8x128xf32> to vector<2x8x32xf32>
    %16 = vector.extract_strided_slice %8 {offsets = [0, 0, 96], sizes = [2, 8, 32], strides = [1, 1, 1]} : vector<2x8x128xf32> to vector<2x8x32xf32>
    %17 = tpu.concatenate %13, %14, %15, %16 in 0 : vector<2x8x32xf32>, vector<2x8x32xf32>, vector<2x8x32xf32>, vector<2x8x32xf32> -> vector<8x8x32xf32>
    %18 = vector.extract_strided_slice %10 {offsets = [0, 0, 0], sizes = [2, 8, 32], strides = [1, 1, 1]} : vector<2x8x128xf32> to vector<2x8x32xf32>
    %19 = vector.extract_strided_slice %10 {offsets = [0, 0, 32], sizes = [2, 8, 32], strides = [1, 1, 1]} : vector<2x8x128xf32> to vector<2x8x32xf32>
    %20 = vector.extract_strided_slice %10 {offsets = [0, 0, 64], sizes = [2, 8, 32], strides = [1, 1, 1]} : vector<2x8x128xf32> to vector<2x8x32xf32>
    %21 = vector.extract_strided_slice %10 {offsets = [0, 0, 96], sizes = [2, 8, 32], strides = [1, 1, 1]} : vector<2x8x128xf32> to vector<2x8x32xf32>
    %22 = tpu.concatenate %18, %19, %20, %21 in 0 : vector<2x8x32xf32>, vector<2x8x32xf32>, vector<2x8x32xf32>, vector<2x8x32xf32> -> vector<8x8x32xf32>
    %23 = vector.extract_strided_slice %12 {offsets = [0, 0, 0], sizes = [2, 8, 32], strides = [1, 1, 1]} : vector<2x8x128xf32> to vector<2x8x32xf32>
    %24 = vector.extract_strided_slice %12 {offsets = [0, 0, 32], sizes = [2, 8, 32], strides = [1, 1, 1]} : vector<2x8x128xf32> to vector<2x8x32xf32>
    %25 = vector.extract_strided_slice %12 {offsets = [0, 0, 64], sizes = [2, 8, 32], strides = [1, 1, 1]} : vector<2x8x128xf32> to vector<2x8x32xf32>
    %26 = vector.extract_strided_slice %12 {offsets = [0, 0, 96], sizes = [2, 8, 32], strides = [1, 1, 1]} : vector<2x8x128xf32> to vector<2x8x32xf32>
    %27 = tpu.concatenate %23, %24, %25, %26 in 0 : vector<2x8x32xf32>, vector<2x8x32xf32>, vector<2x8x32xf32>, vector<2x8x32xf32> -> vector<8x8x32xf32>
    "tpu.trace_start"() <{level = 10 : i32, message = "bqd,bkd->bqk"}> : () -> ()
    %cst_8 = arith.constant dense<0.000000e+00> : vector<8x8x8xf32>
    %28 = tpu.matmul %17, %22, %cst_8 {dimension_numbers = #tpu.dot_dimension_numbers<[2], [2], [1], [1], [0, 0, 0, 1, 1, 1], [0], [0]>} : vector<8x8x32xf32>, vector<8x8x32xf32>, vector<8x8x8xf32> -> vector<8x8x8xf32>
    "tpu.trace_stop"() : () -> ()
    %cst_9 = arith.constant 0.176776692 : f32
    %29 = vector.broadcast %cst_9 : f32 to vector<8x8x8xf32>
    %30 = arith.mulf %28, %29 : vector<8x8x8xf32>
    %31 = arith.addf %30, %1 : vector<8x8x8xf32>
    %cst_10 = arith.constant dense<0xFF800000> : vector<8x8xf32>
    %32 = vector.multi_reduction <maximumf>, %31, %cst_10 [2] : vector<8x8x8xf32> to vector<8x8xf32>
    %33 = vector.shape_cast %32 : vector<8x8xf32> to vector<8x8x1xf32>
    %34 = vector.broadcast %33 : vector<8x8x1xf32> to vector<8x8x8xf32>
    %35 = arith.subf %31, %34 : vector<8x8x8xf32>
    %36 = math.exp %35 : vector<8x8x8xf32>
    %cst_11 = arith.constant dense<0.000000e+00> : vector<8x8xf32>
    %37 = vector.multi_reduction <add>, %36, %cst_11 [2] : vector<8x8x8xf32> to vector<8x8xf32>
    %38 = vector.shape_cast %37 : vector<8x8xf32> to vector<8x8x1xf32>
    %39 = tpu.reciprocal %38 {approx = true} : vector<8x8x1xf32> -> vector<8x8x1xf32>
    %40 = vector.broadcast %39 : vector<8x8x1xf32> to vector<8x8x8xf32>
    %41 = arith.mulf %36, %40 : vector<8x8x8xf32>
    "tpu.trace_start"() <{level = 10 : i32, message = "bqk,bkd->bqd"}> : () -> ()
    %cst_12 = arith.constant dense<0.000000e+00> : vector<8x8x32xf32>
    %42 = tpu.matmul %41, %27, %cst_12 {dimension_numbers = #tpu.dot_dimension_numbers<[2], [1], [1], [2], [0, 0, 0, 1, 1, 2], [0], [0]>} : vector<8x8x8xf32>, vector<8x8x32xf32>, vector<8x8x32xf32> -> vector<8x8x32xf32>
    "tpu.trace_stop"() : () -> ()
    %43 = vector.extract_strided_slice %42 {offsets = [0, 0, 0], sizes = [2, 8, 32], strides = [1, 1, 1]} : vector<8x8x32xf32> to vector<2x8x32xf32>
    %44 = vector.extract_strided_slice %42 {offsets = [2, 0, 0], sizes = [2, 8, 32], strides = [1, 1, 1]} : vector<8x8x32xf32> to vector<2x8x32xf32>
    %45 = vector.extract_strided_slice %42 {offsets = [4, 0, 0], sizes = [2, 8, 32], strides = [1, 1, 1]} : vector<8x8x32xf32> to vector<2x8x32xf32>
    %46 = vector.extract_strided_slice %42 {offsets = [6, 0, 0], sizes = [2, 8, 32], strides = [1, 1, 1]} : vector<8x8x32xf32> to vector<2x8x32xf32>
    %47 = tpu.concatenate %43, %44, %45, %46 in 2 : vector<2x8x32xf32>, vector<2x8x32xf32>, vector<2x8x32xf32>, vector<2x8x32xf32> -> vector<2x8x128xf32>
    %48 = vector.shape_cast %47 : vector<2x8x128xf32> to vector<16x128xf32>
    %c0_13 = arith.constant 0 : index
    %c0_14 = arith.constant 0 : index
    %49 = vector.load %arg4[%c0_13, %c0_14] : memref<128x128xf32, #tpu.memory_space<vmem>>, vector<128x128xf32>
    %cst_15 = arith.constant dense<0.000000e+00> : vector<16x128xf32>
    %50 = tpu.matmul %48, %49, %cst_15 {dimension_numbers = #tpu.dot_dimension_numbers<[1], [0], [0], [1], [0, 0, 1, 1], [], []>} : vector<16x128xf32>, vector<128x128xf32>, vector<16x128xf32> -> vector<16x128xf32>
    %c0_16 = arith.constant 0 : index
    %c0_17 = arith.constant 0 : index
    %51 = vector.load %arg5[%c0_16, %c0_17] : memref<1x128xf32, #tpu.memory_space<vmem>>, vector<1x128xf32>
    %52 = vector.broadcast %51 : vector<1x128xf32> to vector<16x128xf32>
    %53 = arith.addf %50, %52 : vector<16x128xf32>
    %54 = arith.addf %0, %53 : vector<16x128xf32>
    %cst_18 = arith.constant dense<0.000000e+00> : vector<16xf32>
    %55 = vector.multi_reduction <add>, %54, %cst_18 [1] : vector<16x128xf32> to vector<16xf32>
    %56 = vector.shape_cast %55 : vector<16xf32> to vector<16x1xf32>
    %cst_19 = arith.constant 1.280000e+02 : f32
    %57 = vector.broadcast %cst_19 : f32 to vector<16x1xf32>
    %58 = arith.divf %56, %57 : vector<16x1xf32>
    %59 = vector.broadcast %58 : vector<16x1xf32> to vector<16x128xf32>
    %60 = arith.subf %54, %59 : vector<16x128xf32>
    %61 = arith.mulf %60, %60 : vector<16x128xf32>
    %cst_20 = arith.constant dense<0.000000e+00> : vector<16xf32>
    %62 = vector.multi_reduction <add>, %61, %cst_20 [1] : vector<16x128xf32> to vector<16xf32>
    %63 = vector.shape_cast %62 : vector<16xf32> to vector<16x1xf32>
    %cst_21 = arith.constant 1.280000e+02 : f32
    %64 = vector.broadcast %cst_21 : f32 to vector<16x1xf32>
    %65 = arith.divf %63, %64 : vector<16x1xf32>
    %66 = vector.broadcast %58 : vector<16x1xf32> to vector<16x128xf32>
    %67 = arith.subf %54, %66 : vector<16x128xf32>
    %cst_22 = arith.constant 9.99999974E-6 : f32
    %68 = vector.broadcast %cst_22 : f32 to vector<16x1xf32>
    %69 = arith.addf %65, %68 : vector<16x1xf32>
    %70 = math.rsqrt %69 : vector<16x1xf32>
    %71 = vector.broadcast %70 : vector<16x1xf32> to vector<16x128xf32>
    %72 = arith.mulf %67, %71 : vector<16x128xf32>
    %c0_23 = arith.constant 0 : index
    %c0_24 = arith.constant 0 : index
    %73 = vector.load %arg6[%c0_23, %c0_24] : memref<1x128xf32, #tpu.memory_space<vmem>>, vector<1x128xf32>
    %74 = vector.broadcast %73 : vector<1x128xf32> to vector<16x128xf32>
    %75 = arith.mulf %72, %74 : vector<16x128xf32>
    %c0_25 = arith.constant 0 : index
    %c0_26 = arith.constant 0 : index
    %76 = vector.load %arg7[%c0_25, %c0_26] : memref<1x128xf32, #tpu.memory_space<vmem>>, vector<1x128xf32>
    %77 = vector.broadcast %76 : vector<1x128xf32> to vector<16x128xf32>
    %78 = arith.addf %75, %77 : vector<16x128xf32>
    %c0_27 = arith.constant 0 : index
    %c0_28 = arith.constant 0 : index
    %79 = vector.load %arg8[%c0_27, %c0_28] : memref<128x256xf32, #tpu.memory_space<vmem>>, vector<128x256xf32>
    %cst_29 = arith.constant dense<0.000000e+00> : vector<16x256xf32>
    %80 = tpu.matmul %78, %79, %cst_29 {dimension_numbers = #tpu.dot_dimension_numbers<[1], [0], [0], [1], [0, 0, 1, 1], [], []>} : vector<16x128xf32>, vector<128x256xf32>, vector<16x256xf32> -> vector<16x256xf32>
    %c0_30 = arith.constant 0 : index
    %c0_31 = arith.constant 0 : index
    %81 = vector.load %arg9[%c0_30, %c0_31] : memref<1x256xf32, #tpu.memory_space<vmem>>, vector<1x256xf32>
    %82 = vector.broadcast %81 : vector<1x256xf32> to vector<16x256xf32>
    %83 = arith.addf %80, %82 : vector<16x256xf32>
    %cst_32 = arith.constant 0.000000e+00 : f32
    %84 = vector.broadcast %cst_32 : f32 to vector<16x256xf32>
    %85 = arith.maximumf %83, %84 : vector<16x256xf32>
    %c0_33 = arith.constant 0 : index
    %c0_34 = arith.constant 0 : index
    %86 = vector.load %arg10[%c0_33, %c0_34] : memref<256x128xf32, #tpu.memory_space<vmem>>, vector<256x128xf32>
    %cst_35 = arith.constant dense<0.000000e+00> : vector<16x128xf32>
    %87 = tpu.matmul %85, %86, %cst_35 {dimension_numbers = #tpu.dot_dimension_numbers<[1], [0], [0], [1], [0, 0, 1, 1], [], []>} : vector<16x256xf32>, vector<256x128xf32>, vector<16x128xf32> -> vector<16x128xf32>
    %c0_36 = arith.constant 0 : index
    %c0_37 = arith.constant 0 : index
    %88 = vector.load %arg11[%c0_36, %c0_37] : memref<1x128xf32, #tpu.memory_space<vmem>>, vector<1x128xf32>
    %89 = vector.broadcast %88 : vector<1x128xf32> to vector<16x128xf32>
    %90 = arith.addf %87, %89 : vector<16x128xf32>
    %91 = arith.addf %78, %90 : vector<16x128xf32>
    %cst_38 = arith.constant dense<0.000000e+00> : vector<16xf32>
    %92 = vector.multi_reduction <add>, %91, %cst_38 [1] : vector<16x128xf32> to vector<16xf32>
    %93 = vector.shape_cast %92 : vector<16xf32> to vector<16x1xf32>
    %cst_39 = arith.constant 1.280000e+02 : f32
    %94 = vector.broadcast %cst_39 : f32 to vector<16x1xf32>
    %95 = arith.divf %93, %94 : vector<16x1xf32>
    %96 = vector.broadcast %95 : vector<16x1xf32> to vector<16x128xf32>
    %97 = arith.subf %91, %96 : vector<16x128xf32>
    %98 = arith.mulf %97, %97 : vector<16x128xf32>
    %cst_40 = arith.constant dense<0.000000e+00> : vector<16xf32>
    %99 = vector.multi_reduction <add>, %98, %cst_40 [1] : vector<16x128xf32> to vector<16xf32>
    %100 = vector.shape_cast %99 : vector<16xf32> to vector<16x1xf32>
    %cst_41 = arith.constant 1.280000e+02 : f32
    %101 = vector.broadcast %cst_41 : f32 to vector<16x1xf32>
    %102 = arith.divf %100, %101 : vector<16x1xf32>
    %103 = vector.broadcast %95 : vector<16x1xf32> to vector<16x128xf32>
    %104 = arith.subf %91, %103 : vector<16x128xf32>
    %cst_42 = arith.constant 9.99999974E-6 : f32
    %105 = vector.broadcast %cst_42 : f32 to vector<16x1xf32>
    %106 = arith.addf %102, %105 : vector<16x1xf32>
    %107 = math.rsqrt %106 : vector<16x1xf32>
    %108 = vector.broadcast %107 : vector<16x1xf32> to vector<16x128xf32>
    %109 = arith.mulf %104, %108 : vector<16x128xf32>
    %c0_43 = arith.constant 0 : index
    %c0_44 = arith.constant 0 : index
    %110 = vector.load %arg12[%c0_43, %c0_44] : memref<1x128xf32, #tpu.memory_space<vmem>>, vector<1x128xf32>
    %111 = vector.broadcast %110 : vector<1x128xf32> to vector<16x128xf32>
    %112 = arith.mulf %109, %111 : vector<16x128xf32>
    %c0_45 = arith.constant 0 : index
    %c0_46 = arith.constant 0 : index
    %113 = vector.load %arg13[%c0_45, %c0_46] : memref<1x128xf32, #tpu.memory_space<vmem>>, vector<1x128xf32>
    %114 = vector.broadcast %113 : vector<1x128xf32> to vector<16x128xf32>
    %115 = arith.addf %112, %114 : vector<16x128xf32>
    %c0_47 = arith.constant 0 : index
    %c0_48 = arith.constant 0 : index
    %116 = vector.load %arg14[%c0_47, %c0_48] : memref<16x128xf32, #tpu.memory_space<vmem>>, vector<16x128xf32>
    tpu.vector_store %arg14[%c0_47, %c0_48], %115 {strides = array<i32>} : memref<16x128xf32, #tpu.memory_space<vmem>>, vector<16x128xf32>,
    return
  }
}

</mosaic_0001>

<bundles_post_ra>
// kernel: tpu_custom_call.1
= control target key start
LH: loop header
LB: loop body
LE: loop exit
PB: predicated region body
PF: predicated region fallthrough
CT: control target
= control target key end

     0   :  { %19 = vsyncpa [#allocation3], 0  ;;  %s3249_s0 = inlined_call_operand.hbm [shape: f32[16,128], index: 0, kind: input, shape index: {}]   ;;  %s3250_s1 = inlined_call_operand.hbm [shape: f32[8,8,8], index: 1, kind: input, shape index: {}]   ;;  %s3251_s2 = inlined_call_operand.hbm [shape: f32[128,384], index: 2, kind: input, shape index: {}]   ;;  %s3252_s3 = inlined_call_operand.vmem [shape: f32[1,384], index: 3, kind: input, shape index: {}]   ;;  %s3253_s4 = inlined_call_operand.hbm [shape: f32[128,128], index: 4, kind: input, shape index: {}]   ;;  %s3254_s5 = inlined_call_operand.vmem [shape: f32[1,128], index: 5, kind: input, shape index: {}]   ;;  %s3255_s6 = inlined_call_operand.vmem [shape: f32[1,128], index: 6, kind: input, shape index: {}]   ;;  %s3256_s7 = inlined_call_operand.vmem [shape: f32[1,128], index: 7, kind: input, shape index: {}]   ;;  %s3257_s8 = inlined_call_operand.hbm [shape: f32[128,256], index: 8, kind: input, shape index: {}]   ;;  %s3258_s9 = inlined_call_operand.vmem [shape: f32[1,256], index: 9, kind: input, shape index: {}]   ;;  %s3259_s10 = inlined_call_operand.hbm [shape: f32[256,128], index: 10, kind: input, shape index: {}]   ;;  %s3260_s11 = inlined_call_operand.vmem [shape: f32[1,128], index: 11, kind: input, shape index: {}]   ;;  %s3261_s12 = inlined_call_operand.vmem [shape: f32[1,128], index: 12, kind: input, shape index: {}]   ;;  %s3262_s13 = inlined_call_operand.vmem [shape: f32[1,128], index: 13, kind: input, shape index: {}]   ;;  %s3263_s14 = inlined_call_operand.hbm [shape: f32[16,128], index: 14, kind: output, shape index: {}]  }
   0x1   :  { %20 = vsyncpa [#allocation6], 0 }
   0x2   :  { %21 = vsyncpa [#allocation9], 0 }
   0x3   :  { %22 = vsyncpa [#allocation12], 0 }
   0x4   :  { %23 = vsyncpa [#allocation4], 0  ;;  %s2846_s29 = smov [#allocation5]   ;;  %s2847_s15 = smov [#allocation8]  }
   0x5   :  { %s41_s30 = sshll.u32 %s2846_s29, 4  ;;  %s67_s16 = sshll.u32 %s2847_s15, 4  ;;  %s42_s30 = int_to_ptr.vmem [resolvable:$true] %s41_s30  ;;  %s2939_s16 = int_to_ptr.vmem [resolvable:$true] %s67_s16 }
   0x6   :  { %s2682_s19 = scalar_lea.hbm %s3250_s1, 1024 }
   0x7   :  { %p2683_p0 = scmp.ne.s32.totalorder %s3250_s1, %s2682_s19  ;;  %p2686_p1 = scmp.lt.u32.totalorder %s2682_s19, %s3250_s1 }
   0x9   :  { %p2688_p2 = pnand %p2686_p1, %p2683_p0 }
   0xb   :  { %2691 = shalt.err (!%p2688_p2)
}
   0xc   :  { %s2692_s24 = scalar_lea.vmem %s42_s30, 1024  ;;  %p2697_p4 = scmp.lt.s32.totalorder %s42_s30, %s42_s30 }
   0xd   :  { %p2693_p3 = scmp.ne.s32.totalorder %s42_s30, %s2692_s24  ;;  %p2698_p5 = scmp.lt.s32.totalorder %s2692_s24, %s2692_s24 }
   0xf   :  { %p2699_p6 = por %p2698_p5, %p2697_p4 }
  0x11   :  { %p2700_p7 = pnand %p2699_p6, %p2693_p3 }
  0x13   :  { %2703 = shalt.err (!%p2700_p7)
}
  0x14   :  { %s2848_s25 = smov 128   ;;  %s2849_s26 = smov 8  }
  0x15   :  { %47 = dma.hbm_to_vmem [thread:$0]  %s3250_s1, 1024, %s42_s30, [#allocation6], %s2848_s25, %s2848_s25, %s2849_s26  }
  0x16   :  { %s2704_s17 = scalar_lea.hbm %s3253_s4, 2048 }
  0x17   :  { %p2705_p8 = scmp.ne.s32.totalorder %s3253_s4, %s2704_s17  ;;  %p2708_p9 = scmp.lt.u32.totalorder %s2704_s17, %s3253_s4 }
  0x19   :  { %p2710_p10 = pnand %p2708_p9, %p2705_p8 }
  0x1b   :  { %2713 = shalt.err (!%p2710_p10)
}
  0x1c   :  { %s2714_s22 = scalar_lea.vmem %s2939_s16, 2048  ;;  %p2719_p12 = scmp.lt.s32.totalorder %s2939_s16, %s2939_s16 }
  0x1d   :  { %p2715_p11 = scmp.ne.s32.totalorder %s2939_s16, %s2714_s22  ;;  %p2720_p13 = scmp.lt.s32.totalorder %s2714_s22, %s2714_s22 }
  0x1f   :  { %p2721_p0 = por %p2720_p13, %p2719_p12 }
  0x21   :  { %p2722_p1 = pnand %p2721_p0, %p2715_p11 }
  0x23   :  { %2725 = shalt.err (!%p2722_p1)
}
  0x24   :  { %73 = dma.hbm_to_vmem [thread:$0]  %s3253_s4, 2048, %s2939_s16, [#allocation9], %s2848_s25, %s2848_s25, %s2849_s26  }
  0x25   :  { %s2850_s23 = smov [#allocation2]   ;;  %s2851_s27 = smov [#allocation7]  }
  0x26   :  { %s29_s24 = sshll.u32 %s2850_s23, 4  ;;  %s53_s28 = sshll.u32 %s2851_s27, 4  ;;  %s30_s24 = int_to_ptr.vmem [resolvable:$true] %s29_s24  ;;  %s2976_s28 = int_to_ptr.vmem [resolvable:$true] %s53_s28 }
  0x27   :  { %s2726_s17 = scalar_lea.hbm %s3249_s0, 256 }
  0x28   :  { %p2727_p2 = scmp.ne.s32.totalorder %s3249_s0, %s2726_s17  ;;  %p2730_p3 = scmp.lt.u32.totalorder %s2726_s17, %s3249_s0 }
  0x2a   :  { %p2732_p4 = pnand %p2730_p3, %p2727_p2 }
  0x2c   :  { %2735 = shalt.err (!%p2732_p4)
}
  0x2d   :  { %s2736_s4 = scalar_lea.vmem %s30_s24, 256  ;;  %p2741_p6 = scmp.lt.s32.totalorder %s30_s24, %s30_s24 }
  0x2e   :  { %p2737_p5 = scmp.ne.s32.totalorder %s30_s24, %s2736_s4  ;;  %p2742_p7 = scmp.lt.s32.totalorder %s2736_s4, %s2736_s4 }
  0x30   :  { %p2743_p8 = por %p2742_p7, %p2741_p6 }
  0x32   :  { %p2744_p9 = pnand %p2743_p8, %p2737_p5 }
  0x34   :  { %2747 = shalt.err (!%p2744_p9)
}
  0x35   :  { %35 = dma.hbm_to_vmem [thread:$0]  %s3249_s0, 256, %s30_s24, [#allocation3], %s2848_s25, %s2848_s25, %s2849_s26  }
  0x36   :  { %s2748_s23 = scalar_lea.hbm %s3251_s2, 6144 }
  0x37   :  { %p2749_p10 = scmp.ne.s32.totalorder %s3251_s2, %s2748_s23  ;;  %p2752_p11 = scmp.lt.u32.totalorder %s2748_s23, %s3251_s2 }
  0x39   :  { %p2754_p12 = pnand %p2752_p11, %p2749_p10 }
  0x3b   :  { %2757 = shalt.err (!%p2754_p12)
}
  0x3c   :  { %s2758_s18 = scalar_lea.vmem %s2976_s28, 6144  ;;  %p2763_p0 = scmp.lt.s32.totalorder %s2976_s28, %s2976_s28 }
  0x3d   :  { %p2759_p13 = scmp.ne.s32.totalorder %s2976_s28, %s2758_s18  ;;  %p2764_p1 = scmp.lt.s32.totalorder %s2758_s18, %s2758_s18 }
  0x3f   :  { %p2765_p2 = por %p2764_p1, %p2763_p0 }
  0x41   :  { %p2766_p3 = pnand %p2765_p2, %p2759_p13 }
  0x43   :  { %2769 = shalt.err (!%p2766_p3)
}
  0x44   :  { %s2852_s0 = smov 384   ;;  %s2853_s24 = smov 24  }
  0x45   :  { %59 = dma.hbm_to_vmem [thread:$0]  %s3251_s2, 6144, %s2976_s28, [#allocation6], %s2852_s0, %s2852_s0, %s2853_s24  }
  0x46   :  { %s2854_s21 = smov [#allocation10]   ;;  %s2770_s1 = scalar_lea.hbm %s3257_s8, 4096 }
  0x47   :  { %s85_s4 = sshll.u32 %s2854_s21, 4  ;;  %p2771_p4 = scmp.ne.s32.totalorder %s3257_s8, %s2770_s1  ;;  %s86_s4 = int_to_ptr.vmem [resolvable:$true] %s85_s4 }
  0x48   :  { %p2774_p5 = scmp.lt.u32.totalorder %s2770_s1, %s3257_s8 }
  0x4a   :  { %p2776_p6 = pnand %p2774_p5, %p2771_p4 }
  0x4c   :  { %2779 = shalt.err (!%p2776_p6)
}
  0x4d   :  { %s2780_s15 = scalar_lea.vmem %s86_s4, 4096  ;;  %p2785_p8 = scmp.lt.s32.totalorder %s86_s4, %s86_s4 }
  0x4e   :  { %p2781_p7 = scmp.ne.s32.totalorder %s86_s4, %s2780_s15  ;;  %p2786_p9 = scmp.lt.s32.totalorder %s2780_s15, %s2780_s15 }
  0x50   :  { %p2787_p10 = por %p2786_p9, %p2785_p8 }
  0x52   :  { %p2788_p11 = pnand %p2787_p10, %p2781_p7 }
  0x54   :  { %2791 = shalt.err (!%p2788_p11)
}
  0x55   :  { %s2855_s2 = smov 256   ;;  %s2856_s28 = smov 16  }
  0x56   :  { %91 = dma.hbm_to_vmem [thread:$0]  %s3257_s8, 4096, %s86_s4, [#allocation9], %s2855_s2, %s2855_s2, %s2856_s28  }
  0x57   :  { %s2857_s0 = smov [#allocation11]   ;;  %s2792_s21 = scalar_lea.hbm %s3259_s10, 4096 }
  0x58   :  { %s99_s24 = sshll.u32 %s2857_s0, 4  ;;  %p2793_p12 = scmp.ne.s32.totalorder %s3259_s10, %s2792_s21  ;;  %s100_s24 = int_to_ptr.vmem [resolvable:$true] %s99_s24 }
  0x59   :  { %p2796_p13 = scmp.lt.u32.totalorder %s2792_s21, %s3259_s10 }
  0x5b   :  { %p2798_p0 = pnand %p2796_p13, %p2793_p12 }
  0x5d   :  { %2801 = shalt.err (!%p2798_p0)
}
  0x5e   :  { %s2802_s23 = scalar_lea.vmem %s100_s24, 4096  ;;  %p2807_p2 = scmp.lt.s32.totalorder %s100_s24, %s100_s24 }
  0x5f   :  { %p2803_p1 = scmp.ne.s32.totalorder %s100_s24, %s2802_s23  ;;  %p2808_p3 = scmp.lt.s32.totalorder %s2802_s23, %s2802_s23 }
  0x61   :  { %p2809_p4 = por %p2808_p3, %p2807_p2 }
  0x63   :  { %p2810_p5 = pnand %p2809_p4, %p2803_p1 }
  0x65   :  { %2813 = shalt.err (!%p2810_p5)
}
  0x66   :  { %105 = dma.hbm_to_vmem [thread:$0]  %s3259_s10, 4096, %s100_s24, [#allocation12], %s2848_s25, %s2848_s25, %s2849_s26  }
  0x67   :  { %2836 = dma.done.wait [#allocation3], 256  }
  0x68   :  { %2837 = vsyncadd [#allocation3], 4294967040 }
  0x69   :  { %2838 = dma.done.wait [#allocation6], 7168  }
  0x6a   :  { %2839 = vsyncadd [#allocation6], 4294960128 }
  0x6b   :  { %2840 = dma.done.wait [#allocation9], 6144  }
  0x6c   :  { %2841 = vsyncadd [#allocation9], 4294961152 }
  0x6d   :  { %2842 = dma.done.wait [#allocation12], 4096  }
  0x6e   :  { %2843 = vsyncadd [#allocation12], 4294963200  ;;  %v2858_v0 = vmov 0.0   ;;  %v141_v1 = vld [vmem:[#allocation7 + $0x8] sm:$0xff]  ;;  %v144_v2 = vld [vmem:[#allocation7 + $0x20] sm:$0xff]  ;;  %vm2859_vm0 = vmmov 0  }
  0x6f   :  { %269 = vmatprep.mubr.f32.mxu0 %v2858_v0  ;;  %v140_v3 = vld [vmem:[#allocation7] sm:$0xff]  ;;  %v2449_v4 = vpack.c.bf16 %v144_v2, %v141_v1  ;;  %v143_v5 = vld [vmem:[#allocation7 + $0x18] sm:$0xff]  ;;  %v150_v7 = vld [vmem:[#allocation7 + $0x50] sm:$0xff]  ;;  %vm405_vm1 = vcmask 261120   ;;  %s2861_s29 = smov 64   ;;  %s2862_s15 = smov 32  }
  0x70   :  { %v147_v6 = vld [vmem:[#allocation7 + $0x38] sm:$0xff]  ;;  %v2451_v8 = vpack.c.bf16 %v143_v5, %v140_v3  ;;  %v146_v10 = vld [vmem:[#allocation7 + $0x30] sm:$0xff]  ;;  %v149_v11 = vld [vmem:[#allocation7 + $0x48] sm:$0xff]  ;;  %vm1014_vm2 = vcmask 64512   ;;  %vm1713_vm3 = vcmask 523264   ;;  %vm1716_vm4 = vcmask 785408  }
  0x71   :  { %v2453_v9 = vpack.c.bf16 %v150_v7, %v147_v6  ;;  %v153_v12 = vld [vmem:[#allocation7 + $0x68] sm:$0xff]  ;;  %2450 = vmatprep.subr.bf16.mxu0 %v2449_v4  ;;  %v156_v13 = vld [vmem:[#allocation7 + $0x80] sm:$0xff]  ;;  %v2455_v14 = vpack.c.bf16 %v149_v11, %v146_v10  ;;  %v155_v17 = vld [vmem:[#allocation7 + $0x78] sm:$0xff]  ;;  %v190_v6 = vlaneseq  ;;  %s2863_s16 = smov [#allocation13]  }
  0x72   :  { %2452 = vmatpush1.bf16.msra.mxu0 %v2451_v8  ;;  %v2457_v15 = vpack.c.bf16 %v156_v13, %v153_v12  ;;  %v152_v16 = vld [vmem:[#allocation7 + $0x60] sm:$0xff]  ;;  %v159_v18 = vld [vmem:[#allocation7 + $0x98] sm:$0xff]  ;;  %v162_v19 = vld [vmem:[#allocation7 + $0xb0] sm:$0xff]  ;;  %s2148_s22 = sshll.u32 %s2863_s16, 4  ;;  %s2149_s22 = int_to_ptr.vmem [resolvable:$true] %s2148_s22 }
  0x73   :  { %2454 = vmatprep.subr.bf16.mxu0 %v2453_v9  ;;  %v2459_v20 = vpack.c.bf16 %v155_v17, %v152_v16  ;;  %v2461_v21 = vpack.c.bf16 %v162_v19, %v159_v18  ;;  %v158_v22 = vld [vmem:[#allocation7 + $0x90] sm:$0xff]  ;;  %v161_v23 = vld [vmem:[#allocation7 + $0xa8] sm:$0xff]  ;;  %v168_v25 = vld [vmem:[#allocation7 + $0xe0] sm:$0xff]  ;;  %v3049_v7 = vshrl.u32 %v190_v6, 7  ;;  %s2814_s1 = scalar_lea.vmem %s2149_s22, 256  ;;  %p2819_p7 = scmp.lt.s32.totalorder %s2149_s22, %s2149_s22 }
  0x74   :  { %v165_v24 = vld [vmem:[#allocation7 + $0xc8] sm:$0xff]  ;;  %v3038_v26 = vld [vmem:[#allocation2] sm:$0xff]  ;;  %v2463_v27 = vpack.c.bf16 %v161_v23, %v158_v22  ;;  %v164_v29 = vld [vmem:[#allocation7 + $0xc0] sm:$0xff]  ;;  %p2815_p6 = scmp.ne.s32.totalorder %s2149_s22, %s2814_s1  ;;  %p2820_p8 = scmp.lt.s32.totalorder %s2814_s1, %s2814_s1 }
  0x75   :  { %2331 = vmatprep.mubr.f32.mxu1 %v3038_v26  ;;  %v2465_v28 = vpack.c.bf16 %v168_v25, %v165_v24  ;;  %v167_v30 = vld [vmem:[#allocation7 + $0xd8] sm:$0xff]  ;;  %v174_v32 = vld [vmem:[#allocation7 + $0x110] sm:$0xff]  ;;  %v173_v36 = vld [vmem:[#allocation7 + $0x108] sm:$0xff]  ;;  %v196_v11 = vsub.s32 1, %v3049_v7  ;;  %v192_v16 = vsub.s32 0, %v3049_v7 }
  0x76   :  { %2456 = vmatpush1.bf16.msra.mxu0 %v2455_v14  ;;  %v171_v31 = vld [vmem:[#allocation7 + $0xf8] sm:$0xff]  ;;  %v2467_v33 = vpack.c.bf16 %v167_v30, %v164_v29  ;;  %v170_v35 = vld [vmem:[#allocation7 + $0xf0] sm:$0xff]  ;;  %v177_v37 = vld [vmem:[#allocation7 + $0x128] sm:$0xff]  ;;  %p2821_p9 = por %p2820_p8, %p2819_p7 }
  0x77   :  { %2458 = vmatprep.subr.bf16.mxu0 %v2457_v15  ;;  %v2469_v34 = vpack.c.bf16 %v174_v32, %v171_v31  ;;  %v180_v38 = vld [vmem:[#allocation7 + $0x140] sm:$0xff]  ;;  %v2471_v39 = vpack.c.bf16 %v173_v36, %v170_v35  ;;  %v179_v42 = vld [vmem:[#allocation7 + $0x138] sm:$0xff]  ;;  %v186_v44 = vld [vmem:[#allocation7 + $0x170] sm:$0xff] }
  0x78   :  { %v2473_v40 = vpack.c.bf16 %v180_v38, %v177_v37  ;;  %v176_v41 = vld [vmem:[#allocation7 + $0x120] sm:$0xff]  ;;  %v183_v43 = vld [vmem:[#allocation7 + $0x158] sm:$0xff]  ;;  %v182_v47 = vld [vmem:[#allocation7 + $0x150] sm:$0xff]  ;;  %p2822_p10 = pnand %p2821_p9, %p2815_p6 }
  0x79   :  { %v2475_v45 = vpack.c.bf16 %v179_v42, %v176_v41  ;;  %v2477_v46 = vpack.c.bf16 %v186_v44, %v183_v43  ;;  %v185_v48 = vld [vmem:[#allocation7 + $0x168] sm:$0xff]  ;;  %v3044_v50 = vld [vmem:[#allocation2 + $0x8] sm:$0xff]  ;;  %v142_v51 = vld [vmem:[#allocation7 + $0x10] sm:$0xff] }
  0x7a   :  { %2460 = vmatpush1.bf16.msra.mxu0 %v2459_v20  ;;  %v2479_v49 = vpack.c.bf16 %v185_v48, %v182_v47  ;;  %v145_v52 = vld [vmem:[#allocation7 + $0x28] sm:$0xff]  ;;  %v148_v53 = vld [vmem:[#allocation7 + $0x40] sm:$0xff]  ;;  %v151_v55 = vld [vmem:[#allocation7 + $0x58] sm:$0xff] }
  0x7b   :  { %2462 = vmatprep.subr.bf16.mxu0 %v2461_v21  ;;  %v2481_v54 = vpack.c.bf16 %v145_v52, %v142_v51  ;;  %v2485_v56 = vpack.c.bf16 %v151_v55, %v148_v53  ;;  %v154_v57 = vld [vmem:[#allocation7 + $0x70] sm:$0xff]  ;;  %v157_v58 = vld [vmem:[#allocation7 + $0x88] sm:$0xff]  ;;  %v160_v60 = vld [vmem:[#allocation7 + $0xa0] sm:$0xff] }
  0x7c   :  { %v2489_v59 = vpack.c.bf16 %v157_v58, %v154_v57  ;;  %v163_v61 = vld [vmem:[#allocation7 + $0xb8] sm:$0xff]  ;;  %v166_v63 = vld [vmem:[#allocation7 + $0xd0] sm:$0xff]  ;;  %v169_v1 = vld [vmem:[#allocation7 + $0xe8] sm:$0xff] }
  0x7d   :  { %2482 = vmatprep.subr.bf16.mxu1 %v2481_v54  ;;  %v2493_v62 = vpack.c.bf16 %v163_v61, %v160_v60  ;;  %v2497_v2 = vpack.c.bf16 %v169_v1, %v166_v63  ;;  %v172_v3 = vld [vmem:[#allocation7 + $0x100] sm:$0xff]  ;;  %v175_v4 = vld [vmem:[#allocation7 + $0x118] sm:$0xff]  ;;  %v178_v8 = vld [vmem:[#allocation7 + $0x130] sm:$0xff] }
  0x7e   :  { %2464 = vmatpush1.bf16.msra.mxu0 %v2463_v27  ;;  %2484 = vmatpush3.bf16.msra.mxu1 %v2481_v54  ;;  %v2501_v5 = vpack.c.bf16 %v175_v4, %v172_v3  ;;  %v181_v9 = vld [vmem:[#allocation7 + $0x148] sm:$0xff]  ;;  %v184_v12 = vld [vmem:[#allocation7 + $0x160] sm:$0xff]  ;;  %v187_v13 = vld [vmem:[#allocation7 + $0x178] sm:$0xff] }
  0x7f   :  { %2466 = vmatprep.subr.bf16.mxu0 %v2465_v28  ;;  %2486 = vmatprep.subr.bf16.mxu1 %v2485_v56  ;;  %v2505_v10 = vpack.c.bf16 %v181_v9, %v178_v8  ;;  %v3055_v14 = vld [vmem:[%s3252_s3] sm:$0x7]  ;;  %v2509_v15 = vpack.c.bf16 %v187_v13, %v184_v12  ;;  %s2860_s3 = smov 96   ;;  %v132_v44 = vld [vmem:[#allocation5] sm:$0xff]  ;;  %v133_v53 = vld [vmem:[#allocation5 + $0x8] sm:$0xff] }
  0x80   :  { %v197_v17 = vrot.slane %v3055_v14, %v196_v11  ;;  %v193_v19 = vrot.slane %v3055_v14, %v192_v16  ;;  %v134_v60 = vld [vmem:[#allocation5 + $0x10] sm:$0xff]  ;;  %v135_v3 = vld [vmem:[#allocation5 + $0x18] sm:$0xff]  ;;  %v136_v9 = vld [vmem:[#allocation5 + $0x20] sm:$0xff] }
  0x82   :  { %2468 = vmatpush1.bf16.msra.mxu0 %v2467_v33  ;;  %2488 = vmatpush3.bf16.msra.mxu1 %v2485_v56 }
  0x83   :  { %2470 = vmatprep.subr.bf16.mxu0 %v2469_v34  ;;  %2490 = vmatprep.subr.bf16.mxu1 %v2489_v59 }
  0x86   :  { %2472 = vmatpush1.bf16.msra.mxu0 %v2471_v39  ;;  %2492 = vmatpush3.bf16.msra.mxu1 %v2489_v59 }
  0x87   :  { %2474 = vmatprep.subr.bf16.mxu0 %v2473_v40  ;;  %2494 = vmatprep.subr.bf16.mxu1 %v2493_v62  ;;  %v200_v40 = vsub.s32 2, %v3049_v7  ;;  %v2190_v7 = vld [vmem:[%s3260_s11] ss:$0 sm:$0xff] }
  0x89   :  { %v201_v41 = vrot.slane %v3055_v14, %v200_v40 }
  0x8a   :  { %2476 = vmatpush1.bf16.msra.mxu0 %v2475_v45  ;;  %2496 = vmatpush3.bf16.msra.mxu1 %v2493_v62 }
  0x8b   :  { %2478 = vmatprep.subr.bf16.mxu0 %v2477_v46  ;;  %2498 = vmatprep.subr.bf16.mxu1 %v2497_v2 }
  0x8e   :  { %2480 = vmatpush1.bf16.msra.mxu0 %v2479_v49  ;;  %2500 = vmatpush3.bf16.msra.mxu1 %v2497_v2 }
  0x8f   :  { %2334 = vmatprep.subr.mxu0 %v2858_v0  ;;  %2502 = vmatprep.subr.bf16.mxu1 %v2501_v5 }
  0x91   :  { %270 = vmatmul.mubr.f32.vlgmr.msra.gmra.mrb[0].mxu0 %v3038_v26 }
  0x92   :  { %275 = vmatprep.mubr.f32.mxu0 %v2858_v0  ;;  %2504 = vmatpush3.bf16.msra.mxu1 %v2501_v5 }
  0x93   :  { %2506 = vmatprep.subr.bf16.mxu1 %v2505_v10 }
  0x95   :  { %276 = vmatmul.mubr.f32.gmra.mrb[2].mxu0 %v3044_v50 }
  0x96   :  { %2336 = vmatprep.mubr.msk.f32.mxu0 %vm2859_vm0, %v2858_v0  ;;  %2508 = vmatpush3.bf16.msra.mxu1 %v2505_v10 }
  0x97   :  { %2510 = vmatprep.subr.bf16.mxu1 %v2509_v15 }
  0x9a   :  { %2512 = vmatpush3.bf16.msra.mxu1 %v2509_v15 }
  0x9b   :  { %2364 = vmatprep.subr.mxu1 %v2858_v0 }
  0x9d   :  { %2332 = vmatmul.mubr.f32.vlgmr.msra.gmra.mrb[0].mxu1 %v3044_v50 }
  0x9e   :  { %2366 = vmatprep.mubr.msk.f32.mxu1 %vm2859_vm0, %v2858_v0 }
 0x164   :  { %v271_v18 = vpop.f32.mrb[0].mxu0 }
 0x165   :  { %v273_v20 = vpop.f32.mrb[1].mxu0  ;;  %v272_v23 = vadd.f32 %v271_v18, %v193_v19 }
 0x166   :  { %v274_v21 = vadd.f32 %v273_v20, %v197_v17 }
 0x168   :  { %v277_v22 = vpop.f32.mrb[2].mxu0  ;;  %373 = vrot.lane.b32.xlu0 %v274_v21, %s2860_s3  ;;  %2335 = vmatpush3.xpose.msk.msra.mxu0 %vm405_vm1, %v274_v21 }
 0x169   :  { %v278_v24 = vadd.f32 %v277_v22, %v193_v19  ;;  %v279_v25 = vpop.f32.mrb[3].mxu0  ;;  %2339 = vmatprep.subr.mxu0 %v2858_v0  ;;  %v138_v22 = vld [vmem:[#allocation5 + $0x30] sm:$0xff] }
 0x16a   :  { %v280_v27 = vadd.f32 %v279_v25, %v197_v17  ;;  %v137_v17 = vld [vmem:[#allocation5 + $0x28] sm:$0xff] }
 0x16b   :  { %361 = vrot.lane.b32.xlu1 %v278_v24, %s2860_s3  ;;  %2337 = vmatmul.mubr.msk.f32.vlgmr.msra.gmra.mrb[4].mxu0 %vm405_vm1, %v272_v23 }
 0x16c   :  { %359 = vrot.lane.b32.xlu0 %v272_v23, %s2860_s3  ;;  %2340 = vmatpush3.xpose.msk.msra.mxu0 %vm405_vm1, %v280_v27 }
 0x16d   :  { %2341 = vmatprep.mubr.msk.f32.mxu0 %vm2859_vm0, %v2858_v0  ;;  %2344 = vmatprep.subr.mxu0 %v2858_v0 }
 0x16f   :  { %375 = vrot.lane.b32.xlu1 %v280_v27, %s2860_s3  ;;  %2342 = vmatmul.mubr.msk.f32.vlgmr.msra.gmra.mrb[6].mxu0 %vm405_vm1, %v278_v24 }
 0x170   :  { %377 = vrot.lane.b32.xlu0 %v274_v21, %s2861_s29  ;;  %2346 = vmatprep.mubr.msk.f32.mxu0 %vm2859_vm0, %v2858_v0  ;;  %v2333_v42 = vpop.f32.mrb[0].mxu1 }
 0x171   :  { %v348_v45 = vpop.f32.mrb[1].mxu1  ;;  %v3122_v48 = vadd.f32 %v2333_v42, %v201_v41 }
 0x172   :  { %v3124_v49 = vadd.f32 %v348_v45, %v201_v41 }
 0x173   :  { %363 = vrot.lane.b32.xlu1 %v272_v23, %s2861_s29 }
 0x174   :  { %379 = vrot.lane.b32.xlu0 %v280_v27, %s2861_s29 }
 0x177   :  { %365 = vrot.lane.b32.xlu1 %v278_v24, %s2861_s29 }
 0x178   :  { %381 = vrot.lane.b32.xlu0 %v274_v21, %s2862_s15 }
 0x17b   :  { %383 = vrot.lane.b32.xlu1 %v280_v27, %s2862_s15 }
 0x17c   :  { %367 = vrot.lane.b32.xlu0 %v272_v23, %s2862_s15 }
 0x17f   :  { %369 = vrot.lane.b32.xlu1 %v278_v24, %s2862_s15 }
 0x1da   :  { %v374_v28 = vpop.permute.xlu0 %373 }
 0x1db   :  { %2345 = vmatpush3.xpose.msk.msra.mxu0 %vm405_vm1, %v374_v28 }
 0x1dc   :  { %2349 = vmatprep.subr.mxu0 %v2858_v0 }
 0x1dd   :  { %v362_v29 = vpop.permute.xlu1 %361 }
 0x1de   :  { %v360_v30 = vpop.permute.xlu0 %359 }
 0x1df   :  { %2347 = vmatmul.mubr.msk.f32.vlgmr.msra.gmra.mrb[8].mxu0 %vm405_vm1, %v360_v30  ;;  %v139_v30 = vld [vmem:[#allocation5 + $0x38] sm:$0xff] }
 0x1e0   :  { %2351 = vmatprep.mubr.msk.f32.mxu0 %vm2859_vm0, %v2858_v0 }
 0x1e1   :  { %v376_v31 = vpop.permute.xlu1 %375 }
 0x1e2   :  { %v378_v32 = vpop.permute.xlu0 %377  ;;  %2350 = vmatpush3.xpose.msk.msra.mxu0 %vm405_vm1, %v376_v31 }
 0x1e3   :  { %2354 = vmatprep.subr.mxu0 %v2858_v0 }
 0x1e5   :  { %v364_v33 = vpop.permute.xlu1 %363  ;;  %2352 = vmatmul.mubr.msk.f32.vlgmr.msra.gmra.mrb[10].mxu0 %vm405_vm1, %v362_v29 }
 0x1e6   :  { %v380_v34 = vpop.permute.xlu0 %379  ;;  %2355 = vmatpush3.xpose.msk.msra.mxu0 %vm405_vm1, %v378_v32  ;;  %2356 = vmatprep.mubr.msk.f32.mxu0 %vm2859_vm0, %v2858_v0 }
 0x1e7   :  { %2359 = vmatprep.subr.mxu0 %v2858_v0 }
 0x1e9   :  { %v366_v35 = vpop.permute.xlu1 %365  ;;  %2357 = vmatmul.mubr.msk.f32.vlgmr.msra.gmra.mrb[12].mxu0 %vm405_vm1, %v364_v33 }
 0x1ea   :  { %v382_v36 = vpop.permute.xlu0 %381  ;;  %2360 = vmatpush3.xpose.msk.msra.mxu0 %vm405_vm1, %v380_v34  ;;  %2361 = vmatprep.mubr.msk.f32.mxu0 %vm2859_vm0, %v2858_v0 }
 0x1eb   :  { %2365 = vmatpush3.xpose.msk.msra.mxu1 %vm405_vm1, %v382_v36  ;;  %2369 = vmatprep.subr.mxu0 %v2858_v0 }
 0x1ec   :  { %2374 = vmatprep.subr.mxu1 %v2858_v0 }
 0x1ed   :  { %v384_v37 = vpop.permute.xlu1 %383  ;;  %2362 = vmatmul.mubr.msk.f32.vlgmr.msra.gmra.mrb[14].mxu0 %vm405_vm1, %v366_v35 }
 0x1ee   :  { %v368_v38 = vpop.permute.xlu0 %367  ;;  %2370 = vmatpush3.xpose.msk.msra.mxu0 %vm405_vm1, %v384_v37  ;;  %2371 = vmatprep.mubr.msk.f32.mxu0 %vm2859_vm0, %v2858_v0 }
 0x1ef   :  { %2367 = vmatmul.mubr.msk.f32.vlgmr.msra.gmra.mrb[2].mxu1 %vm405_vm1, %v368_v38  ;;  %2379 = vmatprep.subr.mxu0 %v2858_v0 }
 0x1f0   :  { %2376 = vmatprep.mubr.msk.f32.mxu1 %vm2859_vm0, %v2858_v0  ;;  %2375 = vmatpush3.msra.mxu1 %v3124_v49 }
 0x1f1   :  { %v370_v39 = vpop.permute.xlu1 %369  ;;  %2384 = vmatprep.subr.mxu1 %v2858_v0 }
 0x1f2   :  { %2372 = vmatmul.mubr.msk.f32.vlgmr.msra.gmra.mrb[16].mxu0 %vm405_vm1, %v370_v39 }
 0x1f3   :  { %2381 = vmatprep.mubr.msk.f32.mxu0 %vm2859_vm0, %v2858_v0  ;;  %2380 = vmatpush3.msra.mxu0 %v3122_v48 }
 0x1f4   :  { %2389 = vmatprep.subr.mxu0 %v2858_v0 }
 0x23e   :  { %v476_v43 = vpop.f32.mrb[4].mxu0 }
 0x23f   :  { %v998_v46 = vmul.f32 0.17677669, %v476_v43  ;;  %v2338_v47 = vpop.f32.mrb[5].mxu0 }
 0x241   :  { %v3126_v51 = vadd.f32 %v998_v46, %v132_v44 }
 0x242   :  { %v550_v52 = vpop.f32.mrb[6].mxu0 }
 0x243   :  { %v999_v54 = vmul.f32 0.17677669, %v550_v52  ;;  %v2343_v55 = vpop.f32.mrb[7].mxu0  ;;  %v1015_v56 = vsel %vm1014_vm2, %v3126_v51, -inf }
 0x244   :  { %1016 = vmax.xlane.f32.xlu0 %v1015_v56 }
 0x245   :  { %v1007_v57 = vadd.f32 %v999_v54, %v133_v53 }
 0x247   :  { %v1018_v58 = vsel %vm1014_vm2, %v1007_v57, -inf }
 0x248   :  { %1019 = vmax.xlane.f32.xlu1 %v1018_v58 }
 0x2b2   :  { %v624_v59 = vpop.f32.mrb[8].mxu0 }
 0x2b3   :  { %v1000_v61 = vmul.f32 0.17677669, %v624_v59  ;;  %v2348_v62 = vpop.f32.mrb[9].mxu0 }
 0x2b5   :  { %v1008_v63 = vadd.f32 %v1000_v61, %v134_v60 }
 0x2b7   :  { %v1021_v1 = vsel %vm1014_vm2, %v1008_v63, -inf }
 0x2b8   :  { %1022 = vmax.xlane.f32.xlu0 %v1021_v1  ;;  %v698_v2 = vpop.f32.mrb[10].mxu0 }
 0x2b9   :  { %v1001_v4 = vmul.f32 0.17677669, %v698_v2  ;;  %v2353_v5 = vpop.f32.mrb[11].mxu0 }
 0x2bb   :  { %v1009_v6 = vadd.f32 %v1001_v4, %v135_v3 }
 0x2bc   :  { %v772_v8 = vpop.f32.mrb[12].mxu0 }
 0x2bd   :  { %v1002_v10 = vmul.f32 0.17677669, %v772_v8  ;;  %v2358_v12 = vpop.f32.mrb[13].mxu0  ;;  %v1024_v13 = vsel %vm1014_vm2, %v1009_v6, -inf }
 0x2be   :  { %1025 = vmax.xlane.f32.xlu0 %v1024_v13 }
 0x2bf   :  { %v1010_v14 = vadd.f32 %v1002_v10, %v136_v9 }
 0x2c0   :  { %v846_v15 = vpop.f32.mrb[14].mxu0 }
 0x2c1   :  { %v1003_v18 = vmul.f32 0.17677669, %v846_v15  ;;  %v2363_v19 = vpop.f32.mrb[15].mxu0  ;;  %v1027_v20 = vsel %vm1014_vm2, %v1010_v14, -inf }
 0x2c2   :  { %v920_v21 = vpop.f32.mrb[2].mxu1  ;;  %1028 = vmax.xlane.f32.xlu1 %v1027_v20 }
 0x2c3   :  { %v1004_v23 = vmul.f32 0.17677669, %v920_v21  ;;  %v2368_v24 = vpop.f32.mrb[3].mxu1  ;;  %v1011_v25 = vadd.f32 %v1003_v18, %v137_v17 }
 0x2c5   :  { %v994_v27 = vpop.f32.mrb[16].mxu0  ;;  %v1030_v28 = vsel %vm1014_vm2, %v1011_v25, -inf  ;;  %v1012_v29 = vadd.f32 %v1004_v23, %v138_v22 }
 0x2c6   :  { %v1005_v31 = vmul.f32 0.17677669, %v994_v27  ;;  %1031 = vmax.xlane.f32.xlu0 %v1030_v28  ;;  %v2373_v32 = vpop.f32.mrb[17].mxu0 }
 0x2c7   :  { %v1033_v33 = vsel %vm1014_vm2, %v1012_v29, -inf }
 0x2c8   :  { %1034 = vmax.xlane.f32.xlu1 %v1033_v33  ;;  %v1013_v34 = vadd.f32 %v1005_v31, %v139_v30 }
 0x2ca   :  { %v1036_v35 = vsel %vm1014_vm2, %v1013_v34, -inf }
 0x2cb   :  { %1037 = vmax.xlane.f32.xlu0 %v1036_v35 }
 0x2d1   :  { %v1017_v38 = vpop.xlane.xlu0 %1016 }
 0x2d2   :  { %v1039_v40 = vsub.f32 %v3126_v51, %v1017_v38 }
 0x2d4   :  { %v1047_v41 = vmul.f32 1.442695, %v1039_v40 }
 0x2d5   :  { %v1020_v36 = vpop.xlane.xlu1 %1019 }
 0x2d6   :  { %v1040_v37 = vsub.f32 %v1007_v57, %v1020_v36 }
 0x2d8   :  { %v1049_v39 = vmul.f32 1.442695, %v1040_v37 }
 0x2d9   :  { %387 = vrot.lane.b32.xlu1 %v3124_v49, %s2860_s3 }
 0x2da   :  { %2642 = vpow2.f32 %v1049_v39 }
 0x2db   :  { %2644 = vpow2.f32 %v1047_v41 }
 0x2dd   :  { %393 = vrot.lane.b32.xlu1 %v3124_v49, %s2861_s29 }
 0x2e1   :  { %395 = vrot.lane.b32.xlu1 %v3122_v48, %s2861_s29  ;;  %389 = vrot.lane.b32.xlu0 %v3122_v48, %s2860_s3 }
 0x2e4   :  { %v2643_v42 = vpop.eup %2642 }
 0x2e5   :  { %v1066_v43 = vsel %vm1014_vm2, %v2643_v42, 0.0  ;;  %v2645_v44 = vpop.eup %2644 }
 0x2e6   :  { %v1063_v45 = vsel %vm1014_vm2, %v2645_v44, 0.0 }
 0x300   :  { %1067 = vadd.xlane.f32.xlu0 %v1066_v43 }
 0x305   :  { %1064 = vadd.xlane.f32.xlu1 %v1063_v45 }
 0x345   :  { %v1023_v46 = vpop.xlane.xlu0 %1022 }
 0x346   :  { %v1041_v47 = vsub.f32 %v1008_v63, %v1023_v46 }
 0x348   :  { %v1051_v52 = vmul.f32 1.442695, %v1041_v47 }
 0x34a   :  { %2646 = vpow2.f32 %v1051_v52  ;;  %v1719_v52 = vld [vmem:[#allocation8] sm:$0xff] }
 0x34b   :  { %v1026_v53 = vpop.xlane.xlu0 %1025 }
 0x34c   :  { %v1042_v54 = vsub.f32 %v1009_v6, %v1026_v53  ;;  %v1720_v53 = vld [vmem:[#allocation8 + $0x8] sm:$0xff] }
 0x34e   :  { %v1053_v55 = vmul.f32 1.442695, %v1042_v54  ;;  %v1721_v54 = vld [vmem:[#allocation8 + $0x10] sm:$0xff] }
 0x34f   :  { %v1029_v51 = vpop.xlane.xlu1 %1028 }
 0x350   :  { %2648 = vpow2.f32 %v1053_v55  ;;  %v1043_v58 = vsub.f32 %v1010_v14, %v1029_v51  ;;  %v2513_v55 = vpack.c.bf16 %v1720_v53, %v1719_v52  ;;  %v1722_v51 = vld [vmem:[#allocation8 + $0x18] sm:$0xff]  ;;  %v2187_v52 = vld [vmem:[%s3254_s5] ss:$0 sm:$0xff] }
 0x352   :  { %v1055_v2 = vmul.f32 1.442695, %v1043_v58  ;;  %v1724_v58 = vld [vmem:[#allocation8 + $0x28] sm:$0xff] }
 0x353   :  { %v1032_v56 = vpop.xlane.xlu0 %1031 }
 0x354   :  { %v2647_v57 = vpop.eup %2646  ;;  %v1044_v59 = vsub.f32 %v1011_v25, %v1032_v56  ;;  %v2517_v56 = vpack.c.bf16 %v1722_v51, %v1721_v54 }
 0x355   :  { %v1035_v60 = vpop.xlane.xlu1 %1034  ;;  %v1069_v61 = vsel %vm1014_vm2, %v2647_v57, 0.0 }
 0x356   :  { %v1057_v62 = vmul.f32 1.442695, %v1044_v59  ;;  %v1045_v1 = vsub.f32 %v1012_v29, %v1035_v60  ;;  %1070 = vadd.xlane.f32.xlu1 %v1069_v61 }
 0x358   :  { %2650 = vpow2.f32 %v1057_v62  ;;  %v1059_v63 = vmul.f32 1.442695, %v1045_v1  ;;  %v1038_v3 = vpop.xlane.xlu0 %1037 }
 0x359   :  { %v1046_v4 = vsub.f32 %v1013_v34, %v1038_v3  ;;  %v388_v19 = vpop.permute.xlu1 %387 }
 0x35a   :  { %v2649_v5 = vpop.eup %2648  ;;  %2652 = vpow2.f32 %v1059_v63  ;;  %v1726_v63 = vld [vmem:[#allocation8 + $0x38] sm:$0xff] }
 0x35b   :  { %v1061_v6 = vmul.f32 1.442695, %v1046_v4  ;;  %v1072_v8 = vsel %vm1014_vm2, %v2649_v5, 0.0  ;;  %2654 = vpow2.f32 %v1055_v2  ;;  %v1725_v2 = vld [vmem:[#allocation8 + $0x30] sm:$0xff]  ;;  %v1727_v4 = vld [vmem:[#allocation8 + $0x40] sm:$0xff] }
 0x35c   :  { %1073 = vadd.xlane.f32.xlu0 %v1072_v8  ;;  %v390_v21 = vpop.permute.xlu0 %389  ;;  %v2525_v3 = vpack.c.bf16 %v1726_v63, %v1725_v2  ;;  %v1867_v2 = vld [vmem:[#allocation10 + $0x38] sm:$0xff] }
 0x35d   :  { %2656 = vpow2.f32 %v1061_v6  ;;  %v394_v20 = vpop.permute.xlu1 %393  ;;  %v1729_v6 = vld [vmem:[#allocation8 + $0x50] sm:$0xff] }
 0x361   :  { %v396_v23 = vpop.permute.xlu1 %395 }
 0x362   :  { %v2651_v9 = vpop.eup %2650 }
 0x363   :  { %v1078_v10 = vsel %vm1014_vm2, %v2651_v9, 0.0 }
 0x364   :  { %v3155_v12 = vpop.eup %2652  ;;  %1079 = vadd.xlane.f32.xlu0 %v1078_v10 }
 0x365   :  { %v1081_v13 = vsel %vm1014_vm2, %v3155_v12, 0.0  ;;  %v2655_v14 = vpop.eup %2654 }
 0x366   :  { %1082 = vadd.xlane.f32.xlu1 %v1081_v13  ;;  %v1075_v18 = vsel %vm1014_vm2, %v2655_v14, 0.0 }
 0x367   :  { %v2657_v15 = vpop.eup %2656 }
 0x368   :  { %v1084_v17 = vsel %vm1014_vm2, %v2657_v15, 0.0 }
 0x369   :  { %1085 = vadd.xlane.f32.xlu0 %v1084_v17 }
 0x36a   :  { %1076 = vadd.xlane.f32.xlu1 %v1075_v18  ;;  %v1731_v18 = vld [vmem:[#allocation8 + $0x60] sm:$0xff] }
 0x37b   :  { %401 = vrot.lane.b32.xlu1 %v3122_v48, %s2862_s15 }
 0x37f   :  { %399 = vrot.lane.b32.xlu0 %v3124_v49, %s2862_s15 }
 0x38d   :  { %v1068_v22 = vpop.xlane.xlu0 %1067 }
 0x38e   :  { %2658 = vrcp.f32 %v1068_v22  ;;  %v1734_v22 = vld [vmem:[#allocation8 + $0x78] sm:$0xff] }
 0x392   :  { %v1065_v24 = vpop.xlane.xlu1 %1064 }
 0x393   :  { %2660 = vrcp.f32 %v1065_v24 }
 0x398   :  { %v2659_v25 = vpop.eup %2658 }
 0x399   :  { %v1096_v27 = vmul.f32 %v2659_v25, %v2643_v42 }
 0x39b   :  { %2382 = vmatmul.mubr.msk.f32.vlgmr.msra.gmra.mrb[18].mxu0 %vm1014_vm2, %v1096_v27 }
 0x39c   :  { %2390 = vmatpush3.msra.mxu0 %v390_v21  ;;  %2391 = vmatprep.mubr.msk.f32.mxu0 %vm2859_vm0, %v2858_v0  ;;  %v1733_v21 = vld [vmem:[#allocation8 + $0x70] sm:$0xff] }
 0x39d   :  { %v2661_v48 = vpop.eup %2660  ;;  %2399 = vmatprep.subr.mxu0 %v2858_v0 }
 0x39e   :  { %v1095_v49 = vmul.f32 %v2661_v48, %v2645_v44 }
 0x3a0   :  { %2377 = vmatmul.mubr.msk.f32.vlgmr.msra.gmra.mrb[4].mxu1 %vm1014_vm2, %v1095_v49 }
 0x3a1   :  { %2385 = vmatpush3.msra.mxu1 %v388_v19  ;;  %2386 = vmatprep.mubr.msk.f32.mxu1 %vm2859_vm0, %v2858_v0  ;;  %v1732_v19 = vld [vmem:[#allocation8 + $0x68] sm:$0xff] }
 0x3a2   :  { %2394 = vmatprep.subr.mxu1 %v2858_v0 }
 0x3e3   :  { %v1071_v28 = vpop.xlane.xlu1 %1070 }
 0x3e4   :  { %2662 = vrcp.f32 %v1071_v28 }
 0x3e9   :  { %v1074_v29 = vpop.xlane.xlu0 %1073 }
 0x3ea   :  { %2664 = vrcp.f32 %v1074_v29 }
 0x3ee   :  { %v2663_v30 = vpop.eup %2662 }
 0x3ef   :  { %v1097_v31 = vmul.f32 %v2663_v30, %v2647_v57  ;;  %v1723_v57 = vld [vmem:[#allocation8 + $0x20] sm:$0xff] }
 0x3f0   :  { %v2521_v59 = vpack.c.bf16 %v1724_v58, %v1723_v57  ;;  %v1861_v58 = vld [vmem:[#allocation10 + $0x8] sm:$0xff] }
 0x3f1   :  { %2387 = vmatmul.mubr.msk.f32.vlgmr.msra.gmra.mrb[6].mxu1 %vm1014_vm2, %v1097_v31  ;;  %v1080_v32 = vpop.xlane.xlu0 %1079 }
 0x3f2   :  { %2395 = vmatpush3.msra.mxu1 %v394_v20  ;;  %2666 = vrcp.f32 %v1080_v32  ;;  %2396 = vmatprep.mubr.msk.f32.mxu1 %vm2859_vm0, %v2858_v0  ;;  %v2537_v20 = vpack.c.bf16 %v1732_v19, %v1731_v18 }
 0x3f3   :  { %v1083_v33 = vpop.xlane.xlu1 %1082  ;;  %2404 = vmatprep.subr.mxu1 %v2858_v0 }
 0x3f4   :  { %v2665_v34 = vpop.eup %2664 }
 0x3f5   :  { %v1098_v35 = vmul.f32 %v2665_v34, %v2649_v5  ;;  %v1728_v5 = vld [vmem:[#allocation8 + $0x48] sm:$0xff] }
 0x3f6   :  { %v1086_v36 = vpop.xlane.xlu0 %1085  ;;  %v2529_v8 = vpack.c.bf16 %v1728_v5, %v1727_v4  ;;  %v1864_v4 = vld [vmem:[#allocation10 + $0x20] sm:$0xff]  ;;  %v1866_v5 = vld [vmem:[#allocation10 + $0x30] sm:$0xff] }
 0x3f7   :  { %2668 = vrcp.f32 %v1086_v36  ;;  %v1077_v37 = vpop.xlane.xlu1 %1076  ;;  %2392 = vmatmul.mubr.msk.f32.vlgmr.msra.gmra.mrb[20].mxu0 %vm1014_vm2, %v1098_v35 }
 0x3f8   :  { %2670 = vrcp.f32 %v1077_v37  ;;  %2400 = vmatpush3.msra.mxu0 %v396_v23  ;;  %2401 = vmatprep.mubr.msk.f32.mxu0 %vm2859_vm0, %v2858_v0  ;;  %v2541_v23 = vpack.c.bf16 %v1734_v22, %v1733_v21  ;;  %v1873_v22 = vld [vmem:[#allocation10 + $0x68] sm:$0xff] }
 0x3f9   :  { %2409 = vmatprep.subr.mxu0 %v2858_v0  ;;  %2672 = vrcp.f32 %v1083_v33 }
 0x3fa   :  { %v400_v46 = vpop.permute.xlu0 %399 }
 0x3fb   :  { %v402_v40 = vpop.permute.xlu1 %401 }
 0x3fc   :  { %v2667_v38 = vpop.eup %2666 }
 0x3fd   :  { %v1100_v39 = vmul.f32 %v2667_v38, %v2651_v9  ;;  %v1730_v9 = vld [vmem:[#allocation8 + $0x58] sm:$0xff] }
 0x3fe   :  { %v2533_v13 = vpack.c.bf16 %v1730_v9, %v1729_v6  ;;  %v1869_v6 = vld [vmem:[#allocation10 + $0x48] sm:$0xff]  ;;  %v1868_v9 = vld [vmem:[#allocation10 + $0x40] sm:$0xff] }
 0x3ff   :  { %2402 = vmatmul.mubr.msk.f32.vlgmr.msra.gmra.mrb[22].mxu0 %vm1014_vm2, %v1100_v39 }
 0x400   :  { %2410 = vmatpush3.msra.mxu0 %v402_v40  ;;  %2411 = vmatprep.mubr.msk.f32.mxu0 %vm2859_vm0, %v2858_v0 }
 0x401   :  { %v2669_v41 = vpop.eup %2668 }
 0x402   :  { %v2671_v42 = vpop.eup %2670  ;;  %v1102_v43 = vmul.f32 %v2669_v41, %v2657_v15 }
 0x403   :  { %v1099_v44 = vmul.f32 %v2671_v42, %v2655_v14  ;;  %v2673_v45 = vpop.eup %2672 }
 0x404   :  { %2412 = vmatmul.mubr.msk.f32.vlgmr.msra.gmra.mrb[24].mxu0 %vm1014_vm2, %v1102_v43  ;;  %v1101_v47 = vmul.f32 %v2673_v45, %v3155_v12 }
 0x405   :  { %2397 = vmatmul.mubr.msk.f32.vlgmr.msra.gmra.mrb[8].mxu1 %vm1014_vm2, %v1099_v44  ;;  %1968 = vmatprep.mubr.f32.mxu0 %v2858_v0 }
 0x406   :  { %2405 = vmatpush3.msra.mxu1 %v400_v46  ;;  %2406 = vmatprep.mubr.msk.f32.mxu1 %vm2859_vm0, %v2858_v0 }
 0x407   :  { %2514 = vmatprep.subr.bf16.mxu1 %v2513_v55 }
 0x409   :  { %2407 = vmatmul.mubr.msk.f32.vlgmr.msra.gmra.mrb[10].mxu1 %vm1014_vm2, %v1101_v47 }
 0x40a   :  { %2516 = vmatpush3.bf16.msra.mxu1 %v2513_v55 }
 0x40b   :  { %2518 = vmatprep.subr.bf16.mxu1 %v2517_v56 }
 0x40e   :  { %2520 = vmatpush3.bf16.msra.mxu1 %v2517_v56 }
 0x40f   :  { %2522 = vmatprep.subr.bf16.mxu1 %v2521_v59 }
 0x412   :  { %2524 = vmatpush3.bf16.msra.mxu1 %v2521_v59  ;;  %v1863_v59 = vld [vmem:[#allocation10 + $0x18] sm:$0xff] }
 0x413   :  { %2526 = vmatprep.subr.bf16.mxu1 %v2525_v3 }
 0x416   :  { %2528 = vmatpush3.bf16.msra.mxu1 %v2525_v3 }
 0x417   :  { %2530 = vmatprep.subr.bf16.mxu1 %v2529_v8 }
 0x41a   :  { %2532 = vmatpush3.bf16.msra.mxu1 %v2529_v8  ;;  %v1871_v8 = vld [vmem:[#allocation10 + $0x58] sm:$0xff] }
 0x41b   :  { %2534 = vmatprep.subr.bf16.mxu1 %v2533_v13 }
 0x41e   :  { %2536 = vmatpush3.bf16.msra.mxu1 %v2533_v13 }
 0x41f   :  { %2538 = vmatprep.subr.bf16.mxu1 %v2537_v20 }
 0x422   :  { %2540 = vmatpush3.bf16.msra.mxu1 %v2537_v20 }
 0x423   :  { %2542 = vmatprep.subr.bf16.mxu1 %v2541_v23 }
 0x426   :  { %2544 = vmatpush3.bf16.msra.mxu1 %v2541_v23  ;;  %v1875_v23 = vld [vmem:[#allocation10 + $0x78] sm:$0xff] }
 0x46e   :  { %v1245_v60 = vpop.f32.mrb[18].mxu0 }
 0x46f   :  { %v2383_v61 = vpop.f32.mrb[19].mxu0 }
 0x470   :  { %v2545_v61 = vpack.c.bf16 %v1863_v59, %v1861_v58  ;;  %v1986_v58 = vld [vmem:[#allocation11 + $0x8] sm:$0xff]  ;;  %v2003_v59 = vld [vmem:[#allocation11 + $0x90] sm:$0xff] }
 0x472   :  { %2546 = vmatprep.subr.bf16.mxu0 %v2545_v61 }
 0x473   :  { %v1172_v62 = vpop.f32.mrb[4].mxu1 }
 0x474   :  { %v2378_v1 = vpop.f32.mrb[5].mxu1 }
 0x475   :  { %v1865_v1 = vld [vmem:[#allocation10 + $0x28] sm:$0xff] }
 0x476   :  { %v2549_v3 = vpack.c.bf16 %v1867_v2, %v1865_v1  ;;  %v1987_v1 = vld [vmem:[#allocation11 + $0x10] sm:$0xff]  ;;  %v1988_v2 = vld [vmem:[#allocation11 + $0x18] sm:$0xff] }
 0x4c4   :  { %v1318_v10 = vpop.f32.mrb[6].mxu1 }
 0x4c5   :  { %v2388_v12 = vpop.f32.mrb[7].mxu1 }
 0x4ca   :  { %v1391_v14 = vpop.f32.mrb[20].mxu0 }
 0x4cb   :  { %v2627_v15 = vpack.i.bf16 %v1391_v14, %v1318_v10  ;;  %v2393_v17 = vpop.f32.mrb[21].mxu0  ;;  %v1870_v10 = vld [vmem:[#allocation10 + $0x50] sm:$0xff] }
 0x4cc   :  { %v2555_v12 = vpack.c.bf16 %v1870_v10, %v1868_v9 }
 0x4cd   :  { %2628 = vrot.lane.b32.xlu0 %v2627_v15, %s2862_s15 }
 0x4d2   :  { %v1537_v24 = vpop.f32.mrb[22].mxu0 }
 0x4d3   :  { %v2403_v25 = vpop.f32.mrb[23].mxu0 }
 0x4d4   :  { %v1872_v25 = vld [vmem:[#allocation10 + $0x60] sm:$0xff] }
 0x4d7   :  { %v1683_v27 = vpop.f32.mrb[24].mxu0 }
 0x4d8   :  { %v1464_v48 = vpop.f32.mrb[8].mxu1  ;;  %v2413_v49 = vpop.f32.mrb[25].mxu0 }
 0x4d9   :  { %v2632_v28 = vpack.i.bf16 %v1537_v24, %v1464_v48  ;;  %v2398_v29 = vpop.f32.mrb[9].mxu1  ;;  %v2557_v24 = vpack.c.bf16 %v1875_v23, %v1873_v22  ;;  %v1877_v49 = vld [vmem:[#allocation10 + $0x88] sm:$0xff]  ;;  %v2011_v23 = vld [vmem:[#allocation11 + $0xd0] sm:$0xff] }
 0x4da   :  { %v1994_v22 = vld [vmem:[#allocation11 + $0x48] sm:$0xff] }
 0x4db   :  { %2633 = vrot.lane.b32.xlu1 %v2632_v28, %s2861_s29  ;;  %v1879_v28 = vld [vmem:[#allocation10 + $0x98] sm:$0xff] }
 0x4dc   :  { %v1610_v30 = vpop.f32.mrb[10].mxu1  ;;  %v2561_v29 = vpack.c.bf16 %v1879_v28, %v1877_v49  ;;  %v1996_v49 = vld [vmem:[#allocation11 + $0x58] sm:$0xff]  ;;  %v2013_v28 = vld [vmem:[#allocation11 + $0xe0] sm:$0xff] }
 0x4dd   :  { %v2637_v31 = vpack.i.bf16 %v1683_v27, %v1610_v30  ;;  %v2408_v32 = vpop.f32.mrb[11].mxu1  ;;  %v1874_v27 = vld [vmem:[#allocation10 + $0x70] sm:$0xff]  ;;  %v1876_v30 = vld [vmem:[#allocation10 + $0x80] sm:$0xff] }
 0x4de   :  { %v2559_v48 = vpack.c.bf16 %v1874_v27, %v1872_v25  ;;  %v1881_v32 = vld [vmem:[#allocation10 + $0xa8] sm:$0xff] }
 0x4df   :  { %2638 = vrot.lane.b32.xlu0 %v2637_v31, %s2860_s3  ;;  %v1878_v31 = vld [vmem:[#allocation10 + $0x90] sm:$0xff] }
 0x53f   :  { %v2629_v33 = vpop.permute.xlu0 %2628 }
 0x540   :  { %v2631_v35 = vunpack.i.h.bf16 %v2629_v33  ;;  %v2630_v36 = vunpack.i.l.bf16 %v2629_v33  ;;  %v2563_v33 = vpack.c.bf16 %v1878_v31, %v1876_v30 }
 0x542   :  { %v1712_v40 = vsel %vm405_vm1, %v1245_v60, %v2631_v35  ;;  %v1711_v43 = vsel %vm405_vm1, %v1172_v62, %v2630_v36  ;;  %v1860_v60 = vld [vmem:[#allocation10] sm:$0xff]  ;;  %v1862_v62 = vld [vmem:[#allocation10 + $0x10] sm:$0xff] }
 0x543   :  { %v2547_v63 = vpack.c.bf16 %v1862_v62, %v1860_v60  ;;  %v1880_v35 = vld [vmem:[#allocation10 + $0xa0] sm:$0xff]  ;;  %v1882_v36 = vld [vmem:[#allocation10 + $0xb0] sm:$0xff]  ;;  %v2004_v60 = vld [vmem:[#allocation11 + $0x98] sm:$0xff] }
 0x544   :  { %v2581_v62 = vpack.c.bf16 %v2004_v60, %v2003_v59 }
 0x545   :  { %2548 = vmatpush1.bf16.msra.mxu0 %v2547_v63  ;;  %v2005_v63 = vld [vmem:[#allocation11 + $0xa0] sm:$0xff] }
 0x546   :  { %2550 = vmatprep.subr.bf16.mxu0 %v2549_v3  ;;  %v2006_v3 = vld [vmem:[#allocation11 + $0xa8] sm:$0xff] }
 0x54d   :  { %v2634_v34 = vpop.permute.xlu1 %2633 }
 0x54e   :  { %v2636_v37 = vunpack.i.h.bf16 %v2634_v34  ;;  %v2635_v38 = vunpack.i.l.bf16 %v2634_v34  ;;  %v1883_v34 = vld [vmem:[#allocation10 + $0xb8] sm:$0xff] }
 0x550   :  { %v1714_v44 = vsel %vm1713_vm3, %v1711_v43, %v2635_v38  ;;  %v1715_v45 = vsel %vm1713_vm3, %v1712_v40, %v2636_v37  ;;  %v2565_v37 = vpack.c.bf16 %v1883_v34, %v1881_v32  ;;  %v1885_v38 = vld [vmem:[#allocation10 + $0xc8] sm:$0xff]  ;;  %v2567_v40 = vpack.c.bf16 %v1882_v36, %v1880_v35  ;;  %v1886_v43 = vld [vmem:[#allocation10 + $0xd0] sm:$0xff] }
 0x551   :  { %v2639_v39 = vpop.permute.xlu0 %2638 }
 0x552   :  { %v2641_v41 = vunpack.i.h.bf16 %v2639_v39  ;;  %v2640_v42 = vunpack.i.l.bf16 %v2639_v39  ;;  %v1887_v39 = vld [vmem:[#allocation10 + $0xd8] sm:$0xff] }
 0x554   :  { %v1717_v46 = vsel %vm1716_vm4, %v1714_v44, %v2640_v42  ;;  %v1718_v47 = vsel %vm1716_vm4, %v1715_v45, %v2641_v41  ;;  %v2569_v41 = vpack.c.bf16 %v1887_v39, %v1885_v38  ;;  %v1884_v42 = vld [vmem:[#allocation10 + $0xc0] sm:$0xff]  ;;  %v1889_v44 = vld [vmem:[#allocation10 + $0xe8] sm:$0xff]  ;;  %v1891_v45 = vld [vmem:[#allocation10 + $0xf8] sm:$0xff] }
 0x555   :  { %2446 = vmatprep.mubr.f32.mxu1 %v1717_v46  ;;  %v2571_v46 = vpack.c.bf16 %v1886_v43, %v1884_v42  ;;  %v2189_v43 = vld [vmem:[%s3256_s7] ss:$0 sm:$0xff] }
 0x556   :  { %2447 = vmatmul.mubr.f32.vlgmr.msra.gmra.mrb[12].mxu1 %v1718_v47  ;;  %v2573_v47 = vpack.c.bf16 %v1891_v45, %v1889_v44 }
 0x629   :  { %v2448_v53 = vpop.f32.mrb[12].mxu1 }
 0x62a   :  { %v1814_v54 = vadd.f32 %v2448_v53, %v2187_v52  ;;  %v1808_v55 = vpop.f32.mrb[13].mxu1  ;;  %v1890_v53 = vld [vmem:[#allocation10 + $0xf0] sm:$0xff] }
 0x62b   :  { %v1809_v51 = vadd.f32 %v2187_v52, %v1808_v55  ;;  %v1888_v52 = vld [vmem:[#allocation10 + $0xe0] sm:$0xff] }
 0x62c   :  { %v1818_v56 = vadd.f32 %v1814_v54, %v3044_v50  ;;  %v2551_v50 = vpack.c.bf16 %v1866_v5, %v1864_v4  ;;  %v2575_v54 = vpack.c.bf16 %v1890_v53, %v1888_v52  ;;  %v2001_v55 = vld [vmem:[#allocation11 + $0x80] sm:$0xff]  ;;  %v2583_v4 = vpack.c.bf16 %v1988_v2, %v1987_v1  ;;  %v1998_v53 = vld [vmem:[#allocation11 + $0x68] sm:$0xff] }
 0x62d   :  { %v1817_v57 = vadd.f32 %v1809_v51, %v3038_v26  ;;  %v2553_v26 = vpack.c.bf16 %v1871_v8, %v1869_v6  ;;  %v2002_v51 = vld [vmem:[#allocation11 + $0x88] sm:$0xff]  ;;  %v2585_v5 = vpack.c.bf16 %v2006_v3, %v2005_v63  ;;  %v1989_v6 = vld [vmem:[#allocation11 + $0x20] sm:$0xff] }
 0x62e   :  { %1821 = vadd.xlane.f32.xlu0 %v1818_v56  ;;  %2552 = vmatpush1.bf16.msra.mxu0 %v2551_v50  ;;  %v1990_v8 = vld [vmem:[#allocation11 + $0x28] sm:$0xff]  ;;  %v2007_v50 = vld [vmem:[#allocation11 + $0xb0] sm:$0xff]  ;;  %v1997_v52 = vld [vmem:[#allocation11 + $0x60] sm:$0xff] }
 0x62f   :  { %1819 = vadd.xlane.f32.xlu1 %v1817_v57  ;;  %2554 = vmatprep.subr.bf16.mxu0 %v2553_v26  ;;  %v2008_v26 = vld [vmem:[#allocation11 + $0xb8] sm:$0xff]  ;;  %v2587_v9 = vpack.c.bf16 %v1990_v8, %v1989_v6 }
 0x630   :  { %v2589_v10 = vpack.c.bf16 %v2008_v26, %v2007_v50 }
 0x632   :  { %2556 = vmatpush1.bf16.msra.mxu0 %v2555_v12  ;;  %v1991_v12 = vld [vmem:[#allocation11 + $0x30] sm:$0xff] }
 0x633   :  { %2558 = vmatprep.subr.bf16.mxu0 %v2557_v24  ;;  %v2012_v24 = vld [vmem:[#allocation11 + $0xd8] sm:$0xff] }
 0x634   :  { %v2597_v27 = vpack.c.bf16 %v2012_v24, %v2011_v23 }
 0x636   :  { %2560 = vmatpush1.bf16.msra.mxu0 %v2559_v48  ;;  %v1995_v48 = vld [vmem:[#allocation11 + $0x50] sm:$0xff] }
 0x637   :  { %2562 = vmatprep.subr.bf16.mxu0 %v2561_v29  ;;  %v2014_v29 = vld [vmem:[#allocation11 + $0xe8] sm:$0xff]  ;;  %v2599_v30 = vpack.c.bf16 %v1996_v49, %v1995_v48 }
 0x638   :  { %v2601_v31 = vpack.c.bf16 %v2014_v29, %v2013_v28 }
 0x63a   :  { %2564 = vmatpush1.bf16.msra.mxu0 %v2563_v33 }
 0x63b   :  { %2566 = vmatprep.subr.bf16.mxu0 %v2565_v37 }
 0x63e   :  { %2568 = vmatpush1.bf16.msra.mxu0 %v2567_v40  ;;  %v2188_v40 = vld [vmem:[%s3255_s6] ss:$0 sm:$0xff] }
 0x63f   :  { %2570 = vmatprep.subr.bf16.mxu0 %v2569_v41 }
 0x642   :  { %2572 = vmatpush1.bf16.msra.mxu0 %v2571_v46 }
 0x643   :  { %2574 = vmatprep.subr.bf16.mxu0 %v2573_v47 }
 0x646   :  { %2576 = vmatpush1.bf16.msra.mxu0 %v2575_v54  ;;  %v2603_v54 = vpack.c.bf16 %v1998_v53, %v1997_v52 }
 0x6bb   :  { %v1822_v13 = vpop.xlane.xlu0 %1821 }
 0x6bc   :  { %v1825_v14 = vmul.f32 0.0078125, %v1822_v13  ;;  %v1820_v15 = vpop.xlane.xlu1 %1819  ;;  %v1992_v13 = vld [vmem:[#allocation11 + $0x38] sm:$0xff] }
 0x6bd   :  { %v1824_v17 = vmul.f32 0.0078125, %v1820_v15  ;;  %v2010_v15 = vld [vmem:[#allocation11 + $0xc8] sm:$0xff] }
 0x6be   :  { %v3201_v18 = vsub.f32 %v1818_v56, %v1825_v14  ;;  %v1985_v56 = vld [vmem:[#allocation11] sm:$0xff] }
 0x6bf   :  { %v3203_v19 = vsub.f32 %v1817_v57, %v1824_v17  ;;  %v2577_v57 = vpack.c.bf16 %v2002_v51, %v2001_v55  ;;  %v2579_v61 = vpack.c.bf16 %v1986_v58, %v1985_v56  ;;  %v2009_v14 = vld [vmem:[#allocation11 + $0xc0] sm:$0xff]  ;;  %v2591_v17 = vpack.c.bf16 %v1992_v13, %v1991_v12  ;;  %v2015_v55 = vld [vmem:[#allocation11 + $0xf0] sm:$0xff]  ;;  %v2000_v56 = vld [vmem:[#allocation11 + $0x78] sm:$0xff] }
 0x6c0   :  { %v1829_v20 = vmul.f32 %v3201_v18, %v3201_v18  ;;  %v1892_v58 = vld [vmem:[%s3258_s9] sm:$0x3] }
 0x6c1   :  { %v1828_v21 = vmul.f32 %v3203_v19, %v3203_v19  ;;  %2578 = vmatprep.subr.bf16.mxu1 %v2577_v57  ;;  %v1901_v59 = vrot.slane %v1892_v58, %v196_v11 }
 0x6c2   :  { %1832 = vadd.xlane.f32.xlu1 %v1829_v20  ;;  %2580 = vmatpush3.bf16.msra.mxu1 %v2579_v61  ;;  %v2593_v20 = vpack.c.bf16 %v2010_v15, %v2009_v14 }
 0x6c3   :  { %1830 = vadd.xlane.f32.xlu0 %v1828_v21  ;;  %2582 = vmatprep.subr.bf16.mxu1 %v2581_v62  ;;  %v1993_v21 = vld [vmem:[#allocation11 + $0x40] sm:$0xff] }
 0x6c4   :  { %v2595_v25 = vpack.c.bf16 %v1994_v22, %v1993_v21 }
 0x6c6   :  { %2584 = vmatpush3.bf16.msra.mxu1 %v2583_v4 }
 0x6c7   :  { %2586 = vmatprep.subr.bf16.mxu1 %v2585_v5 }
 0x6ca   :  { %2588 = vmatpush3.bf16.msra.mxu1 %v2587_v9 }
 0x6cb   :  { %2590 = vmatprep.subr.bf16.mxu1 %v2589_v10 }
 0x6ce   :  { %2592 = vmatpush3.bf16.msra.mxu1 %v2591_v17 }
 0x6cf   :  { %2594 = vmatprep.subr.bf16.mxu1 %v2593_v20 }
 0x6d2   :  { %2596 = vmatpush3.bf16.msra.mxu1 %v2595_v25 }
 0x6d3   :  { %2598 = vmatprep.subr.bf16.mxu1 %v2597_v27 }
 0x6d6   :  { %2600 = vmatpush3.bf16.msra.mxu1 %v2599_v30 }
 0x6d7   :  { %2602 = vmatprep.subr.bf16.mxu1 %v2601_v31 }
 0x6da   :  { %2604 = vmatpush3.bf16.msra.mxu1 %v2603_v54 }
 0x74f   :  { %v1833_v32 = vpop.xlane.xlu1 %1832 }
 0x750   :  { %v1835_v33 = vmul.f32 0.0078125, %v1833_v32  ;;  %v1831_v34 = vpop.xlane.xlu0 %1830 }
 0x751   :  { %v1834_v35 = vmul.f32 0.0078125, %v1831_v34  ;;  %v2191_v34 = vld [vmem:[%s3261_s12] ss:$0 sm:$0xff] }
 0x752   :  { %v1837_v36 = vadd.f32 1e-05, %v1835_v33 }
 0x753   :  { %v1836_v37 = vadd.f32 1e-05, %v1834_v35 }
 0x754   :  { %2674 = vrsqrt.f32 %v1837_v36  ;;  %v2192_v36 = vld [vmem:[%s3262_s13] ss:$0 sm:$0xff] }
 0x755   :  { %2676 = vrsqrt.f32 %v1836_v37 }
 0x75e   :  { %v2675_v38 = vpop.eup %2674 }
 0x75f   :  { %v2677_v39 = vpop.eup %2676  ;;  %v1841_v42 = vmul.f32 %v2675_v38, %v3201_v18  ;;  %v1999_v18 = vld [vmem:[#allocation11 + $0x70] sm:$0xff] }
 0x760   :  { %v1840_v41 = vmul.f32 %v2677_v39, %v3203_v19  ;;  %v2016_v19 = vld [vmem:[#allocation11 + $0xf8] sm:$0xff]  ;;  %v2607_v57 = vpack.c.bf16 %v2000_v56, %v1999_v18 }
 0x761   :  { %v1850_v46 = vmul.f32 %v2188_v40, %v1841_v42  ;;  %v2605_v51 = vpack.c.bf16 %v2016_v19, %v2015_v55 }
 0x762   :  { %v1849_v44 = vmul.f32 %v2188_v40, %v1840_v41 }
 0x763   :  { %v1859_v47 = vadd.f32 %v2189_v43, %v1850_v46  ;;  %2606 = vmatprep.subr.bf16.mxu1 %v2605_v51 }
 0x764   :  { %v1858_v45 = vadd.f32 %v2189_v43, %v1849_v44  ;;  %2608 = vmatpush3.bf16.msra.mxu1 %v2607_v57 }
 0x766   :  { %1969 = vmatmul.mubr.f32.vlgmr.msra.gmra.mrb[26].mxu0 %v1858_v45 }
 0x767   :  { %1974 = vmatprep.mubr.f32.mxu0 %v2858_v0  ;;  %v1897_v0 = vrot.slane %v1892_v58, %v192_v16 }
 0x76a   :  { %1975 = vmatmul.mubr.f32.gmra.mrb[28].mxu0 %v1859_v47 }
 0x839   :  { %v1970_v60 = vpop.f32.mrb[26].mxu0 }
 0x83a   :  { %v1971_v61 = vadd.f32 %v1970_v60, %v1897_v0  ;;  %v1972_v62 = vpop.f32.mrb[27].mxu0 }
 0x83b   :  { %v1973_v1 = vadd.f32 %v1972_v62, %v1901_v59 }
 0x83c   :  { %v1981_v3 = vmax.f32 %v1971_v61, 0.0 }
 0x83d   :  { %v1982_v2 = vmax.f32 %v1973_v1, 0.0  ;;  %v1976_v63 = vpop.f32.mrb[28].mxu0 }
 0x83e   :  { %v1977_v4 = vadd.f32 %v1976_v63, %v1897_v0  ;;  %v1978_v5 = vpop.f32.mrb[29].mxu0 }
 0x83f   :  { %v1979_v6 = vadd.f32 %v1978_v5, %v1901_v59  ;;  %2088 = vmatprep.mubr.f32.mxu1 %v1982_v2 }
 0x840   :  { %2089 = vmatmul.mubr.f32.vlgmr.msra.gmra.mrb[14].mxu1 %v1981_v3  ;;  %v1983_v50 = vmax.f32 %v1977_v4, 0.0 }
 0x841   :  { %v1984_v8 = vmax.f32 %v1979_v6, 0.0 }
 0x843   :  { %2093 = vmatprep.mubr.f32.mxu1 %v1984_v8 }
 0x844   :  { %2094 = vmatmul.mubr.f32.gmra.mrb[16].mxu1 %v1983_v50 }
 0x913   :  { %v2293_v16 = vpop.f32.mrb[14].mxu1 }
 0x914   :  { %v2294_v11 = vpop.f32.mrb[15].mxu1 }
 0x915   :  { %v2295_v26 = vadd.f32 %v2294_v11, %v2293_v16 }
 0x917   :  { %v2091_v9 = vadd.f32 %v2295_v26, %v2190_v7  ;;  %v2296_v10 = vpop.f32.mrb[16].mxu1 }
 0x918   :  { %v2297_v12 = vpop.f32.mrb[17].mxu1 }
 0x919   :  { %v2298_v13 = vadd.f32 %v2297_v12, %v2296_v10  ;;  %v2099_v14 = vadd.f32 %v2091_v9, %v1858_v45 }
 0x91b   :  { %v2096_v15 = vadd.f32 %v2298_v13, %v2190_v7  ;;  %2101 = vadd.xlane.f32.xlu0 %v2099_v14 }
 0x91d   :  { %v2100_v17 = vadd.f32 %v2096_v15, %v1859_v47 }
 0x91f   :  { %2103 = vadd.xlane.f32.xlu1 %v2100_v17 }
 0x9a8   :  { %v2102_v20 = vpop.xlane.xlu0 %2101 }
 0x9a9   :  { %v2105_v21 = vmul.f32 0.0078125, %v2102_v20 }
 0x9ab   :  { %v2107_v22 = vsub.f32 %v2099_v14, %v2105_v21 }
 0x9ac   :  { %v2104_v23 = vpop.xlane.xlu1 %2103 }
 0x9ad   :  { %v2106_v24 = vmul.f32 0.0078125, %v2104_v23  ;;  %v2109_v25 = vmul.f32 %v2107_v22, %v2107_v22 }
 0x9af   :  { %v2108_v27 = vsub.f32 %v2100_v17, %v2106_v24  ;;  %2111 = vadd.xlane.f32.xlu0 %v2109_v25 }
 0x9b1   :  { %v2110_v48 = vmul.f32 %v2108_v27, %v2108_v27 }
 0x9b3   :  { %2113 = vadd.xlane.f32.xlu1 %v2110_v48 }
 0xa3c   :  { %v2112_v49 = vpop.xlane.xlu0 %2111 }
 0xa3d   :  { %v2115_v28 = vmul.f32 0.0078125, %v2112_v49 }
 0xa3f   :  { %v2117_v29 = vadd.f32 1e-05, %v2115_v28 }
 0xa40   :  { %v2114_v30 = vpop.xlane.xlu1 %2113 }
 0xa41   :  { %2678 = vrsqrt.f32 %v2117_v29  ;;  %v2116_v31 = vmul.f32 0.0078125, %v2114_v30 }
 0xa43   :  { %v2118_v32 = vadd.f32 1e-05, %v2116_v31 }
 0xa45   :  { %2680 = vrsqrt.f32 %v2118_v32 }
 0xa4b   :  { %v2679_v33 = vpop.eup %2678 }
 0xa4c   :  { %v2121_v35 = vmul.f32 %v2679_v33, %v2107_v22 }
 0xa4e   :  { %v2130_v37 = vmul.f32 %v2191_v34, %v2121_v35 }
 0xa4f   :  { %v2681_v38 = vpop.eup %2680 }
 0xa50   :  { %v2122_v39 = vmul.f32 %v2681_v38, %v2108_v27  ;;  %v2139_v40 = vadd.f32 %v2192_v36, %v2130_v37 }
 0xa52   :  { %v2131_v41 = vmul.f32 %v2191_v34, %v2122_v39  ;;  %2141 = vst [vmem:[#allocation13] sm:$0xff] %v2139_v40 }
 0xa54   :  { %v2140_v42 = vadd.f32 %v2192_v36, %v2131_v41 }
 0xa56   :  { %2142 = vst [vmem:[#allocation13 + $0x8] sm:$0xff] %v2140_v42 }
 0xa57   :  { %2825 = shalt.err (!%p2822_p10)
}
 0xa58   :  { %s2826_s30 = scalar_lea.hbm %s3263_s14, 256 }
 0xa59   :  { %p2827_p11 = scmp.ne.s32.totalorder %s3263_s14, %s2826_s30  ;;  %p2830_p12 = scmp.lt.u32.totalorder %s2826_s30, %s3263_s14 }
 0xa5b   :  { %p2832_p13 = pnand %p2830_p12, %p2827_p11 }
 0xa5d   :  { %2835 = shalt.err (!%p2832_p13)
}
 0xa5e   :  { %2154 = dma.vmem_to_hbm [thread:$0]  %s2149_s22, 256, %s3263_s14, [#allocation4], %s2848_s25, %s2848_s25, %s2849_s26  }
 0xa5f   :  { %2844 = dma.done.wait [#allocation4], 256  }
 0xa60   :  { %2845 = vsyncadd [#allocation4], 4294967040 }
 0xa61   :  { %2158 = vsyncpa [#allocation3], 1 }
 0xa62   :  { %2159 = vsyncpa [#allocation6], 1 }
 0xa63   :  { %2160 = vsyncpa [#allocation9], 1 }
 0xa64   :  { %2161 = vsyncpa [#allocation12], 1 }
 0xa65   :  { %2162 = vsyncpa [#allocation4], 1 }

</bundles_post_ra>
